<compile_context>
chip_gen: v7x
topology: tpu7x:2x2x1
jax: 0.10.0
libtpu: 0.0.40
codegen_flags: <defaults>
</compile_context>

<pallas_src>
import functools
import math

import jax
import jax.numpy as jnp
from jax.experimental import pallas as pl


# ----------------------------------------------------------------------------
# Fused kernel: all transformer blocks + classification head + batch softmax.
# ----------------------------------------------------------------------------
def _layernorm(x, w, b, eps=1e-5):
    mu = jnp.mean(x, axis=-1, keepdims=True)
    var = jnp.mean((x - mu) ** 2, axis=-1, keepdims=True)
    return (x - mu) * jax.lax.rsqrt(var + eps) * w + b


def fused_transformer_kernel(
    x_ref,
    wqkv_ref, wu_ref, bu_ref,
    ln1w_ref, ln1b_ref,
    w1_ref, b1_ref, w2_ref, b2_ref,
    ln2w_ref, ln2b_ref,
    wc_ref, bc_ref,
    o_ref,
    *, depth, heads, b, t, k,
):
    scale = 1.0 / math.sqrt(k)
    hk = heads * k

    # Fold batch into the matmul M dimension: (b, t, k) -> (b*t, k).
    x2d = x_ref[...].astype(jnp.float32).reshape(b * t, k)

    # Static (unrolled) loop over layers; weights stay resident in VMEM.
    for layer in range(depth):
        # Fused QKV projection: one (b*t, k) @ (k, 3*h*k) MXU pass.
        qkv = jnp.dot(x2d.astype(jnp.bfloat16), wqkv_ref[layer],
                      preferred_element_type=jnp.float32)          # (b*t, 3*h*k)

        head_outs = []
        for hi in range(heads):  # static loop (heads=1 in the demo)
            sl_q = slice(hi * k, (hi + 1) * k)
            sl_k = slice(hk + hi * k, hk + (hi + 1) * k)
            sl_v = slice(2 * hk + hi * k, 2 * hk + (hi + 1) * k)
            qh = qkv[:, sl_q].reshape(b, t, k)
            kh = qkv[:, sl_k].reshape(b, t, k)
            vh = qkv[:, sl_v].reshape(b, t, k)

            s = jnp.einsum('bqd,bkd->bqk',
                           qh.astype(jnp.bfloat16), kh.astype(jnp.bfloat16),
                           preferred_element_type=jnp.float32) * scale   # (b, t, t)
            s = s - jnp.max(s, axis=-1, keepdims=True)
            p = jnp.exp(s)
            p = p * pl.reciprocal(jnp.sum(p, axis=-1, keepdims=True), approx=True)
            # dropout(p) is the identity in eval mode.
            head_outs.append(
                jnp.einsum('bqk,bkd->bqd',
                           p.astype(jnp.bfloat16), vh.astype(jnp.bfloat16),
                           preferred_element_type=jnp.float32))          # (b, t, k)

        attn = head_outs[0] if heads == 1 else jnp.concatenate(head_outs, axis=-1)
        attn2d = attn.reshape(b * t, hk)

        # unify_heads: Linear(heads*k, k) with bias
        attended = jnp.dot(attn2d.astype(jnp.bfloat16), wu_ref[layer],
                           preferred_element_type=jnp.float32) + bu_ref[layer]

        # residual + LayerNorm 1 (f32 elementwise math)
        x1 = _layernorm(attended + x2d, ln1w_ref[layer], ln1b_ref[layer])

        # MLP: Linear(k, 2k) -> ReLU -> Linear(2k, k)
        h1 = jnp.dot(x1.astype(jnp.bfloat16), w1_ref[layer],
                     preferred_element_type=jnp.float32) + b1_ref[layer]
        h1 = jnp.maximum(h1, 0.0)
        ff = jnp.dot(h1.astype(jnp.bfloat16), w2_ref[layer],
                     preferred_element_type=jnp.float32) + b2_ref[layer]

        # residual + LayerNorm 2
        x2d = _layernorm(ff + x1, ln2w_ref[layer], ln2b_ref[layer])

    # Classification head: mean over the sequence axis, then Linear.
    seq_avg = jnp.mean(x2d.reshape(b, t, k), axis=1)                 # (b, k)
    logits = jnp.dot(seq_avg.astype(jnp.bfloat16), wc_ref[...],
                     preferred_element_type=jnp.float32) + bc_ref[...]   # (b, out)

    # Softmax over dim=0 (the batch axis, as in the reference).
    logits = logits - jnp.max(logits, axis=0, keepdims=True)
    e = jnp.exp(logits)
    o_ref[...] = (e * pl.reciprocal(jnp.sum(e, axis=0, keepdims=True),
                                    approx=True)).astype(o_ref.dtype)


# ----------------------------------------------------------------------------
# Wrapper: a single gridless pallas_call; everything fits in VMEM (<1 MiB).
# ----------------------------------------------------------------------------
def transformer_forward(x, params):
    b, t, k = x.shape
    depth, heads = params["depth"], params["heads"]
    out_dim = params["wc"].shape[-1]

    kernel = functools.partial(
        fused_transformer_kernel, depth=depth, heads=heads, b=b, t=t, k=k)

    return pl.pallas_call(
        kernel,
        out_shape=jax.ShapeDtypeStruct((b, out_dim), x.dtype),
    )(x,
      params["wqkv"], params["wu"], params["bu"],
      params["ln1w"], params["ln1b"],
      params["w1"], params["b1"], params["w2"], params["b2"],
      params["ln2w"], params["ln2b"],
      params["wc"], params["bc"])


# ----------------------------------------------------------------------------
# Deterministic synthetic parameters (stacked over depth; matmul weights bf16).
# ----------------------------------------------------------------------------
def init_params(key, in_dim, out_dim, nhead, depth):
    k = in_dim
    s = 0.05
    keys = jax.random.split(key, depth * 6 + 1)

    def rnd(i, shape):
        return jax.random.normal(keys[i], shape, jnp.float32) * s

    wqkv, wu, w1, w2 = [], [], [], []
    for d in range(depth):
        base = d * 6
        wq = rnd(base + 0, (k, k * nhead))
        wk = rnd(base + 1, (k, k * nhead))
        wv = rnd(base + 2, (k, k * nhead))
        wqkv.append(jnp.concatenate([wq, wk, wv], axis=-1))   # (k, 3*h*k)
        wu.append(rnd(base + 3, (k * nhead, k)))
        w1.append(rnd(base + 4, (k, 2 * k)))
        w2.append(rnd(base + 5, (2 * k, k)))

    params = dict(
        depth=depth,
        heads=nhead,
        wqkv=jnp.stack(wqkv).astype(jnp.bfloat16),
        wu=jnp.stack(wu).astype(jnp.bfloat16),
        bu=jnp.zeros((depth, 1, k), jnp.float32),
        ln1w=jnp.ones((depth, 1, k), jnp.float32),
        ln1b=jnp.zeros((depth, 1, k), jnp.float32),
        w1=jnp.stack(w1).astype(jnp.bfloat16),
        b1=jnp.zeros((depth, 1, 2 * k), jnp.float32),
        w2=jnp.stack(w2).astype(jnp.bfloat16),
        b2=jnp.zeros((depth, 1, k), jnp.float32),
        ln2w=jnp.ones((depth, 1, k), jnp.float32),
        ln2b=jnp.zeros((depth, 1, k), jnp.float32),
        wc=(jax.random.normal(keys[depth * 6], (k, out_dim), jnp.float32)
            * s).astype(jnp.bfloat16),
        bc=jnp.zeros((1, out_dim), jnp.float32),
    )
    return params


if __name__ == "__main__":
    # Small shapes consistent with the module: batch=2, seq=8, in_dim=32.
    B, T, IN_DIM, OUT_DIM, NHEAD, DEPTH = 2, 8, 32, 8, 1, 2

    key = jax.random.PRNGKey(0)
    kx, kp = jax.random.split(key)
    x = jax.random.normal(kx, (B, T, IN_DIM), jnp.float32)

    params = init_params(kp, IN_DIM, OUT_DIM, NHEAD, DEPTH)

    out = transformer_forward(x, params)
    out = jax.block_until_ready(out)

    assert out.shape == (B, OUT_DIM)
    assert bool(jnp.all(jnp.isfinite(out)))
    # softmax over dim=0: each output column sums to 1 across the batch
    # (approx-reciprocal denominator -> loose tolerance).
    assert jnp.allclose(jnp.sum(out, axis=0), jnp.ones((OUT_DIM,)), atol=1e-2)

    print("KERNEL_OK")
</pallas_src>

<mosaic_0001>
module attributes {stable_mosaic.version = 11 : i64} {
  func.func @fused_transformer_kernel(%arg0: memref<2x8x32xf32, #tpu.memory_space<vmem>>, %arg1: memref<2x32x96xbf16, #tpu.memory_space<vmem>>, %arg2: memref<2x32x32xbf16, #tpu.memory_space<vmem>>, %arg3: memref<2x1x32xf32, #tpu.memory_space<vmem>>, %arg4: memref<2x1x32xf32, #tpu.memory_space<vmem>>, %arg5: memref<2x1x32xf32, #tpu.memory_space<vmem>>, %arg6: memref<2x32x64xbf16, #tpu.memory_space<vmem>>, %arg7: memref<2x1x64xf32, #tpu.memory_space<vmem>>, %arg8: memref<2x64x32xbf16, #tpu.memory_space<vmem>>, %arg9: memref<2x1x32xf32, #tpu.memory_space<vmem>>, %arg10: memref<2x1x32xf32, #tpu.memory_space<vmem>>, %arg11: memref<2x1x32xf32, #tpu.memory_space<vmem>>, %arg12: memref<32x8xbf16, #tpu.memory_space<vmem>>, %arg13: memref<1x8xf32, #tpu.memory_space<vmem>>, %arg14: memref<2x8xf32, #tpu.memory_space<vmem>>) attributes {dimension_semantics = [], scalar_prefetch = 0 : i64, scratch_operands = 0 : i64, tpu.core_type = #tpu.core_type<tc>} {
    %c0 = arith.constant 0 : index
    %c0_0 = arith.constant 0 : index
    %c0_1 = arith.constant 0 : index
    %0 = vector.load %arg0[%c0, %c0_0, %c0_1] : memref<2x8x32xf32, #tpu.memory_space<vmem>>, vector<2x8x32xf32>
    %1 = vector.shape_cast %0 : vector<2x8x32xf32> to vector<16x32xf32>
    %2 = arith.truncf %1 : vector<16x32xf32> to vector<16x32xbf16>
    %c0_2 = arith.constant 0 : index
    %c0_3 = arith.constant 0 : index
    %c0_4 = arith.constant 0 : index
    %3 = vector.load %arg1[%c0_2, %c0_3, %c0_4] : memref<2x32x96xbf16, #tpu.memory_space<vmem>>, vector<1x32x96xbf16>
    %4 = vector.shape_cast %3 : vector<1x32x96xbf16> to vector<32x96xbf16>
    %cst = arith.constant dense<0.000000e+00> : vector<16x96xf32>
    %5 = tpu.matmul %2, %4, %cst {dimension_numbers = #tpu.dot_dimension_numbers<[1], [0], [0], [1], [0, 0, 1, 1], [], []>} : vector<16x32xbf16>, vector<32x96xbf16>, vector<16x96xf32> -> vector<16x96xf32>
    %6 = vector.extract_strided_slice %5 {offsets = [0, 0], sizes = [16, 32], strides = [1, 1]} : vector<16x96xf32> to vector<16x32xf32>
    %7 = vector.shape_cast %6 : vector<16x32xf32> to vector<2x8x32xf32>
    %8 = vector.extract_strided_slice %5 {offsets = [0, 32], sizes = [16, 32], strides = [1, 1]} : vector<16x96xf32> to vector<16x32xf32>
    %9 = vector.shape_cast %8 : vector<16x32xf32> to vector<2x8x32xf32>
    %10 = vector.extract_strided_slice %5 {offsets = [0, 64], sizes = [16, 32], strides = [1, 1]} : vector<16x96xf32> to vector<16x32xf32>
    %11 = vector.shape_cast %10 : vector<16x32xf32> to vector<2x8x32xf32>
    %12 = arith.truncf %7 : vector<2x8x32xf32> to vector<2x8x32xbf16>
    %13 = arith.truncf %9 : vector<2x8x32xf32> to vector<2x8x32xbf16>
    "tpu.trace_start"() <{level = 10 : i32, message = "bqd,bkd->bqk"}> : () -> ()
    %cst_5 = arith.constant dense<0.000000e+00> : vector<2x8x8xf32>
    %14 = tpu.matmul %12, %13, %cst_5 {dimension_numbers = #tpu.dot_dimension_numbers<[2], [2], [1], [1], [0, 0, 0, 1, 1, 1], [0], [0]>} : vector<2x8x32xbf16>, vector<2x8x32xbf16>, vector<2x8x8xf32> -> vector<2x8x8xf32>
    "tpu.trace_stop"() : () -> ()
    %cst_6 = arith.constant 0.176776692 : f32
    %15 = vector.broadcast %cst_6 : f32 to vector<2x8x8xf32>
    %16 = arith.mulf %14, %15 : vector<2x8x8xf32>
    %cst_7 = arith.constant dense<0xFF800000> : vector<2x8xf32>
    %17 = vector.multi_reduction <maximumf>, %16, %cst_7 [2] : vector<2x8x8xf32> to vector<2x8xf32>
    %18 = vector.shape_cast %17 : vector<2x8xf32> to vector<2x8x1xf32>
    %19 = vector.broadcast %18 : vector<2x8x1xf32> to vector<2x8x8xf32>
    %20 = arith.subf %16, %19 : vector<2x8x8xf32>
    %21 = math.exp %20 : vector<2x8x8xf32>
    %cst_8 = arith.constant dense<0.000000e+00> : vector<2x8xf32>
    %22 = vector.multi_reduction <add>, %21, %cst_8 [2] : vector<2x8x8xf32> to vector<2x8xf32>
    %23 = vector.shape_cast %22 : vector<2x8xf32> to vector<2x8x1xf32>
    %24 = tpu.reciprocal %23 {approx = true} : vector<2x8x1xf32> -> vector<2x8x1xf32>
    %25 = vector.broadcast %24 : vector<2x8x1xf32> to vector<2x8x8xf32>
    %26 = arith.mulf %21, %25 : vector<2x8x8xf32>
    %27 = arith.truncf %26 : vector<2x8x8xf32> to vector<2x8x8xbf16>
    %28 = arith.truncf %11 : vector<2x8x32xf32> to vector<2x8x32xbf16>
    "tpu.trace_start"() <{level = 10 : i32, message = "bqk,bkd->bqd"}> : () -> ()
    %cst_9 = arith.constant dense<0.000000e+00> : vector<2x8x32xf32>
    %29 = tpu.matmul %27, %28, %cst_9 {dimension_numbers = #tpu.dot_dimension_numbers<[2], [1], [1], [2], [0, 0, 0, 1, 1, 2], [0], [0]>} : vector<2x8x8xbf16>, vector<2x8x32xbf16>, vector<2x8x32xf32> -> vector<2x8x32xf32>
    "tpu.trace_stop"() : () -> ()
    %30 = vector.shape_cast %29 : vector<2x8x32xf32> to vector<16x32xf32>
    %31 = arith.truncf %30 : vector<16x32xf32> to vector<16x32xbf16>
    %c0_10 = arith.constant 0 : index
    %c0_11 = arith.constant 0 : index
    %c0_12 = arith.constant 0 : index
    %32 = vector.load %arg2[%c0_10, %c0_11, %c0_12] : memref<2x32x32xbf16, #tpu.memory_space<vmem>>, vector<1x32x32xbf16>
    %33 = vector.shape_cast %32 : vector<1x32x32xbf16> to vector<32x32xbf16>
    %cst_13 = arith.constant dense<0.000000e+00> : vector<16x32xf32>
    %34 = tpu.matmul %31, %33, %cst_13 {dimension_numbers = #tpu.dot_dimension_numbers<[1], [0], [0], [1], [0, 0, 1, 1], [], []>} : vector<16x32xbf16>, vector<32x32xbf16>, vector<16x32xf32> -> vector<16x32xf32>
    %c0_14 = arith.constant 0 : index
    %c0_15 = arith.constant 0 : index
    %c0_16 = arith.constant 0 : index
    %35 = vector.load %arg3[%c0_14, %c0_15, %c0_16] : memref<2x1x32xf32, #tpu.memory_space<vmem>>, vector<1x1x32xf32>
    %36 = vector.shape_cast %35 : vector<1x1x32xf32> to vector<1x32xf32>
    %37 = vector.broadcast %36 : vector<1x32xf32> to vector<16x32xf32>
    %38 = arith.addf %34, %37 : vector<16x32xf32>
    %39 = arith.addf %38, %1 : vector<16x32xf32>
    %c0_17 = arith.constant 0 : index
    %c0_18 = arith.constant 0 : index
    %c0_19 = arith.constant 0 : index
    %40 = vector.load %arg4[%c0_17, %c0_18, %c0_19] : memref<2x1x32xf32, #tpu.memory_space<vmem>>, vector<1x1x32xf32>
    %41 = vector.shape_cast %40 : vector<1x1x32xf32> to vector<1x32xf32>
    %c0_20 = arith.constant 0 : index
    %c0_21 = arith.constant 0 : index
    %c0_22 = arith.constant 0 : index
    %42 = vector.load %arg5[%c0_20, %c0_21, %c0_22] : memref<2x1x32xf32, #tpu.memory_space<vmem>>, vector<1x1x32xf32>
    %43 = vector.shape_cast %42 : vector<1x1x32xf32> to vector<1x32xf32>
    %cst_23 = arith.constant dense<0.000000e+00> : vector<16xf32>
    %44 = vector.multi_reduction <add>, %39, %cst_23 [1] : vector<16x32xf32> to vector<16xf32>
    %45 = vector.shape_cast %44 : vector<16xf32> to vector<16x1xf32>
    %cst_24 = arith.constant 3.200000e+01 : f32
    %46 = vector.broadcast %cst_24 : f32 to vector<16x1xf32>
    %47 = arith.divf %45, %46 : vector<16x1xf32>
    %48 = vector.broadcast %47 : vector<16x1xf32> to vector<16x32xf32>
    %49 = arith.subf %39, %48 : vector<16x32xf32>
    %50 = arith.mulf %49, %49 : vector<16x32xf32>
    %cst_25 = arith.constant dense<0.000000e+00> : vector<16xf32>
    %51 = vector.multi_reduction <add>, %50, %cst_25 [1] : vector<16x32xf32> to vector<16xf32>
    %52 = vector.shape_cast %51 : vector<16xf32> to vector<16x1xf32>
    %cst_26 = arith.constant 3.200000e+01 : f32
    %53 = vector.broadcast %cst_26 : f32 to vector<16x1xf32>
    %54 = arith.divf %52, %53 : vector<16x1xf32>
    %55 = vector.broadcast %47 : vector<16x1xf32> to vector<16x32xf32>
    %56 = arith.subf %39, %55 : vector<16x32xf32>
    %cst_27 = arith.constant 9.99999974E-6 : f32
    %57 = vector.broadcast %cst_27 : f32 to vector<16x1xf32>
    %58 = arith.addf %54, %57 : vector<16x1xf32>
    %59 = math.rsqrt %58 : vector<16x1xf32>
    %60 = vector.broadcast %59 : vector<16x1xf32> to vector<16x32xf32>
    %61 = arith.mulf %56, %60 : vector<16x32xf32>
    %62 = vector.broadcast %41 : vector<1x32xf32> to vector<16x32xf32>
    %63 = arith.mulf %61, %62 : vector<16x32xf32>
    %64 = vector.broadcast %43 : vector<1x32xf32> to vector<16x32xf32>
    %65 = arith.addf %63, %64 : vector<16x32xf32>
    %66 = arith.truncf %65 : vector<16x32xf32> to vector<16x32xbf16>
    %c0_28 = arith.constant 0 : index
    %c0_29 = arith.constant 0 : index
    %c0_30 = arith.constant 0 : index
    %67 = vector.load %arg6[%c0_28, %c0_29, %c0_30] : memref<2x32x64xbf16, #tpu.memory_space<vmem>>, vector<1x32x64xbf16>
    %68 = vector.shape_cast %67 : vector<1x32x64xbf16> to vector<32x64xbf16>
    %cst_31 = arith.constant dense<0.000000e+00> : vector<16x64xf32>
    %69 = tpu.matmul %66, %68, %cst_31 {dimension_numbers = #tpu.dot_dimension_numbers<[1], [0], [0], [1], [0, 0, 1, 1], [], []>} : vector<16x32xbf16>, vector<32x64xbf16>, vector<16x64xf32> -> vector<16x64xf32>
    %c0_32 = arith.constant 0 : index
    %c0_33 = arith.constant 0 : index
    %c0_34 = arith.constant 0 : index
    %70 = vector.load %arg7[%c0_32, %c0_33, %c0_34] : memref<2x1x64xf32, #tpu.memory_space<vmem>>, vector<1x1x64xf32>
    %71 = vector.shape_cast %70 : vector<1x1x64xf32> to vector<1x64xf32>
    %72 = vector.broadcast %71 : vector<1x64xf32> to vector<16x64xf32>
    %73 = arith.addf %69, %72 : vector<16x64xf32>
    %cst_35 = arith.constant 0.000000e+00 : f32
    %74 = vector.broadcast %cst_35 : f32 to vector<16x64xf32>
    %75 = arith.maximumf %73, %74 : vector<16x64xf32>
    %76 = arith.truncf %75 : vector<16x64xf32> to vector<16x64xbf16>
    %c0_36 = arith.constant 0 : index
    %c0_37 = arith.constant 0 : index
    %c0_38 = arith.constant 0 : index
    %77 = vector.load %arg8[%c0_36, %c0_37, %c0_38] : memref<2x64x32xbf16, #tpu.memory_space<vmem>>, vector<1x64x32xbf16>
    %78 = vector.shape_cast %77 : vector<1x64x32xbf16> to vector<64x32xbf16>
    %cst_39 = arith.constant dense<0.000000e+00> : vector<16x32xf32>
    %79 = tpu.matmul %76, %78, %cst_39 {dimension_numbers = #tpu.dot_dimension_numbers<[1], [0], [0], [1], [0, 0, 1, 1], [], []>} : vector<16x64xbf16>, vector<64x32xbf16>, vector<16x32xf32> -> vector<16x32xf32>
    %c0_40 = arith.constant 0 : index
    %c0_41 = arith.constant 0 : index
    %c0_42 = arith.constant 0 : index
    %80 = vector.load %arg9[%c0_40, %c0_41, %c0_42] : memref<2x1x32xf32, #tpu.memory_space<vmem>>, vector<1x1x32xf32>
    %81 = vector.shape_cast %80 : vector<1x1x32xf32> to vector<1x32xf32>
    %82 = vector.broadcast %81 : vector<1x32xf32> to vector<16x32xf32>
    %83 = arith.addf %79, %82 : vector<16x32xf32>
    %84 = arith.addf %83, %65 : vector<16x32xf32>
    %c0_43 = arith.constant 0 : index
    %c0_44 = arith.constant 0 : index
    %c0_45 = arith.constant 0 : index
    %85 = vector.load %arg10[%c0_43, %c0_44, %c0_45] : memref<2x1x32xf32, #tpu.memory_space<vmem>>, vector<1x1x32xf32>
    %86 = vector.shape_cast %85 : vector<1x1x32xf32> to vector<1x32xf32>
    %c0_46 = arith.constant 0 : index
    %c0_47 = arith.constant 0 : index
    %c0_48 = arith.constant 0 : index
    %87 = vector.load %arg11[%c0_46, %c0_47, %c0_48] : memref<2x1x32xf32, #tpu.memory_space<vmem>>, vector<1x1x32xf32>
    %88 = vector.shape_cast %87 : vector<1x1x32xf32> to vector<1x32xf32>
    %cst_49 = arith.constant dense<0.000000e+00> : vector<16xf32>
    %89 = vector.multi_reduction <add>, %84, %cst_49 [1] : vector<16x32xf32> to vector<16xf32>
    %90 = vector.shape_cast %89 : vector<16xf32> to vector<16x1xf32>
    %cst_50 = arith.constant 3.200000e+01 : f32
    %91 = vector.broadcast %cst_50 : f32 to vector<16x1xf32>
    %92 = arith.divf %90, %91 : vector<16x1xf32>
    %93 = vector.broadcast %92 : vector<16x1xf32> to vector<16x32xf32>
    %94 = arith.subf %84, %93 : vector<16x32xf32>
    %95 = arith.mulf %94, %94 : vector<16x32xf32>
    %cst_51 = arith.constant dense<0.000000e+00> : vector<16xf32>
    %96 = vector.multi_reduction <add>, %95, %cst_51 [1] : vector<16x32xf32> to vector<16xf32>
    %97 = vector.shape_cast %96 : vector<16xf32> to vector<16x1xf32>
    %cst_52 = arith.constant 3.200000e+01 : f32
    %98 = vector.broadcast %cst_52 : f32 to vector<16x1xf32>
    %99 = arith.divf %97, %98 : vector<16x1xf32>
    %100 = vector.broadcast %92 : vector<16x1xf32> to vector<16x32xf32>
    %101 = arith.subf %84, %100 : vector<16x32xf32>
    %cst_53 = arith.constant 9.99999974E-6 : f32
    %102 = vector.broadcast %cst_53 : f32 to vector<16x1xf32>
    %103 = arith.addf %99, %102 : vector<16x1xf32>
    %104 = math.rsqrt %103 : vector<16x1xf32>
    %105 = vector.broadcast %104 : vector<16x1xf32> to vector<16x32xf32>
    %106 = arith.mulf %101, %105 : vector<16x32xf32>
    %107 = vector.broadcast %86 : vector<1x32xf32> to vector<16x32xf32>
    %108 = arith.mulf %106, %107 : vector<16x32xf32>
    %109 = vector.broadcast %88 : vector<1x32xf32> to vector<16x32xf32>
    %110 = arith.addf %108, %109 : vector<16x32xf32>
    %111 = arith.truncf %110 : vector<16x32xf32> to vector<16x32xbf16>
    %c1 = arith.constant 1 : index
    %c0_54 = arith.constant 0 : index
    %c0_55 = arith.constant 0 : index
    %112 = vector.load %arg1[%c1, %c0_54, %c0_55] : memref<2x32x96xbf16, #tpu.memory_space<vmem>>, vector<1x32x96xbf16>
    %113 = vector.shape_cast %112 : vector<1x32x96xbf16> to vector<32x96xbf16>
    %cst_56 = arith.constant dense<0.000000e+00> : vector<16x96xf32>
    %114 = tpu.matmul %111, %113, %cst_56 {dimension_numbers = #tpu.dot_dimension_numbers<[1], [0], [0], [1], [0, 0, 1, 1], [], []>} : vector<16x32xbf16>, vector<32x96xbf16>, vector<16x96xf32> -> vector<16x96xf32>
    %115 = vector.extract_strided_slice %114 {offsets = [0, 0], sizes = [16, 32], strides = [1, 1]} : vector<16x96xf32> to vector<16x32xf32>
    %116 = vector.shape_cast %115 : vector<16x32xf32> to vector<2x8x32xf32>
    %117 = vector.extract_strided_slice %114 {offsets = [0, 32], sizes = [16, 32], strides = [1, 1]} : vector<16x96xf32> to vector<16x32xf32>
    %118 = vector.shape_cast %117 : vector<16x32xf32> to vector<2x8x32xf32>
    %119 = vector.extract_strided_slice %114 {offsets = [0, 64], sizes = [16, 32], strides = [1, 1]} : vector<16x96xf32> to vector<16x32xf32>
    %120 = vector.shape_cast %119 : vector<16x32xf32> to vector<2x8x32xf32>
    %121 = arith.truncf %116 : vector<2x8x32xf32> to vector<2x8x32xbf16>
    %122 = arith.truncf %118 : vector<2x8x32xf32> to vector<2x8x32xbf16>
    "tpu.trace_start"() <{level = 10 : i32, message = "bqd,bkd->bqk"}> : () -> ()
    %cst_57 = arith.constant dense<0.000000e+00> : vector<2x8x8xf32>
    %123 = tpu.matmul %121, %122, %cst_57 {dimension_numbers = #tpu.dot_dimension_numbers<[2], [2], [1], [1], [0, 0, 0, 1, 1, 1], [0], [0]>} : vector<2x8x32xbf16>, vector<2x8x32xbf16>, vector<2x8x8xf32> -> vector<2x8x8xf32>
    "tpu.trace_stop"() : () -> ()
    %cst_58 = arith.constant 0.176776692 : f32
    %124 = vector.broadcast %cst_58 : f32 to vector<2x8x8xf32>
    %125 = arith.mulf %123, %124 : vector<2x8x8xf32>
    %cst_59 = arith.constant dense<0xFF800000> : vector<2x8xf32>
    %126 = vector.multi_reduction <maximumf>, %125, %cst_59 [2] : vector<2x8x8xf32> to vector<2x8xf32>
    %127 = vector.shape_cast %126 : vector<2x8xf32> to vector<2x8x1xf32>
    %128 = vector.broadcast %127 : vector<2x8x1xf32> to vector<2x8x8xf32>
    %129 = arith.subf %125, %128 : vector<2x8x8xf32>
    %130 = math.exp %129 : vector<2x8x8xf32>
    %cst_60 = arith.constant dense<0.000000e+00> : vector<2x8xf32>
    %131 = vector.multi_reduction <add>, %130, %cst_60 [2] : vector<2x8x8xf32> to vector<2x8xf32>
    %132 = vector.shape_cast %131 : vector<2x8xf32> to vector<2x8x1xf32>
    %133 = tpu.reciprocal %132 {approx = true} : vector<2x8x1xf32> -> vector<2x8x1xf32>
    %134 = vector.broadcast %133 : vector<2x8x1xf32> to vector<2x8x8xf32>
    %135 = arith.mulf %130, %134 : vector<2x8x8xf32>
    %136 = arith.truncf %135 : vector<2x8x8xf32> to vector<2x8x8xbf16>
    %137 = arith.truncf %120 : vector<2x8x32xf32> to vector<2x8x32xbf16>
    "tpu.trace_start"() <{level = 10 : i32, message = "bqk,bkd->bqd"}> : () -> ()
    %cst_61 = arith.constant dense<0.000000e+00> : vector<2x8x32xf32>
    %138 = tpu.matmul %136, %137, %cst_61 {dimension_numbers = #tpu.dot_dimension_numbers<[2], [1], [1], [2], [0, 0, 0, 1, 1, 2], [0], [0]>} : vector<2x8x8xbf16>, vector<2x8x32xbf16>, vector<2x8x32xf32> -> vector<2x8x32xf32>
    "tpu.trace_stop"() : () -> ()
    %139 = vector.shape_cast %138 : vector<2x8x32xf32> to vector<16x32xf32>
    %140 = arith.truncf %139 : vector<16x32xf32> to vector<16x32xbf16>
    %c1_62 = arith.constant 1 : index
    %c0_63 = arith.constant 0 : index
    %c0_64 = arith.constant 0 : index
    %141 = vector.load %arg2[%c1_62, %c0_63, %c0_64] : memref<2x32x32xbf16, #tpu.memory_space<vmem>>, vector<1x32x32xbf16>
    %142 = vector.shape_cast %141 : vector<1x32x32xbf16> to vector<32x32xbf16>
    %cst_65 = arith.constant dense<0.000000e+00> : vector<16x32xf32>
    %143 = tpu.matmul %140, %142, %cst_65 {dimension_numbers = #tpu.dot_dimension_numbers<[1], [0], [0], [1], [0, 0, 1, 1], [], []>} : vector<16x32xbf16>, vector<32x32xbf16>, vector<16x32xf32> -> vector<16x32xf32>
    %c1_66 = arith.constant 1 : index
    %c0_67 = arith.constant 0 : index
    %c0_68 = arith.constant 0 : index
    %144 = vector.load %arg3[%c1_66, %c0_67, %c0_68] : memref<2x1x32xf32, #tpu.memory_space<vmem>>, vector<1x1x32xf32>
    %145 = vector.shape_cast %144 : vector<1x1x32xf32> to vector<1x32xf32>
    %146 = vector.broadcast %145 : vector<1x32xf32> to vector<16x32xf32>
    %147 = arith.addf %143, %146 : vector<16x32xf32>
    %148 = arith.addf %147, %110 : vector<16x32xf32>
    %c1_69 = arith.constant 1 : index
    %c0_70 = arith.constant 0 : index
    %c0_71 = arith.constant 0 : index
    %149 = vector.load %arg4[%c1_69, %c0_70, %c0_71] : memref<2x1x32xf32, #tpu.memory_space<vmem>>, vector<1x1x32xf32>
    %150 = vector.shape_cast %149 : vector<1x1x32xf32> to vector<1x32xf32>
    %c1_72 = arith.constant 1 : index
    %c0_73 = arith.constant 0 : index
    %c0_74 = arith.constant 0 : index
    %151 = vector.load %arg5[%c1_72, %c0_73, %c0_74] : memref<2x1x32xf32, #tpu.memory_space<vmem>>, vector<1x1x32xf32>
    %152 = vector.shape_cast %151 : vector<1x1x32xf32> to vector<1x32xf32>
    %cst_75 = arith.constant dense<0.000000e+00> : vector<16xf32>
    %153 = vector.multi_reduction <add>, %148, %cst_75 [1] : vector<16x32xf32> to vector<16xf32>
    %154 = vector.shape_cast %153 : vector<16xf32> to vector<16x1xf32>
    %cst_76 = arith.constant 3.200000e+01 : f32
    %155 = vector.broadcast %cst_76 : f32 to vector<16x1xf32>
    %156 = arith.divf %154, %155 : vector<16x1xf32>
    %157 = vector.broadcast %156 : vector<16x1xf32> to vector<16x32xf32>
    %158 = arith.subf %148, %157 : vector<16x32xf32>
    %159 = arith.mulf %158, %158 : vector<16x32xf32>
    %cst_77 = arith.constant dense<0.000000e+00> : vector<16xf32>
    %160 = vector.multi_reduction <add>, %159, %cst_77 [1] : vector<16x32xf32> to vector<16xf32>
    %161 = vector.shape_cast %160 : vector<16xf32> to vector<16x1xf32>
    %cst_78 = arith.constant 3.200000e+01 : f32
    %162 = vector.broadcast %cst_78 : f32 to vector<16x1xf32>
    %163 = arith.divf %161, %162 : vector<16x1xf32>
    %164 = vector.broadcast %156 : vector<16x1xf32> to vector<16x32xf32>
    %165 = arith.subf %148, %164 : vector<16x32xf32>
    %cst_79 = arith.constant 9.99999974E-6 : f32
    %166 = vector.broadcast %cst_79 : f32 to vector<16x1xf32>
    %167 = arith.addf %163, %166 : vector<16x1xf32>
    %168 = math.rsqrt %167 : vector<16x1xf32>
    %169 = vector.broadcast %168 : vector<16x1xf32> to vector<16x32xf32>
    %170 = arith.mulf %165, %169 : vector<16x32xf32>
    %171 = vector.broadcast %150 : vector<1x32xf32> to vector<16x32xf32>
    %172 = arith.mulf %170, %171 : vector<16x32xf32>
    %173 = vector.broadcast %152 : vector<1x32xf32> to vector<16x32xf32>
    %174 = arith.addf %172, %173 : vector<16x32xf32>
    %175 = arith.truncf %174 : vector<16x32xf32> to vector<16x32xbf16>
    %c1_80 = arith.constant 1 : index
    %c0_81 = arith.constant 0 : index
    %c0_82 = arith.constant 0 : index
    %176 = vector.load %arg6[%c1_80, %c0_81, %c0_82] : memref<2x32x64xbf16, #tpu.memory_space<vmem>>, vector<1x32x64xbf16>
    %177 = vector.shape_cast %176 : vector<1x32x64xbf16> to vector<32x64xbf16>
    %cst_83 = arith.constant dense<0.000000e+00> : vector<16x64xf32>
    %178 = tpu.matmul %175, %177, %cst_83 {dimension_numbers = #tpu.dot_dimension_numbers<[1], [0], [0], [1], [0, 0, 1, 1], [], []>} : vector<16x32xbf16>, vector<32x64xbf16>, vector<16x64xf32> -> vector<16x64xf32>
    %c1_84 = arith.constant 1 : index
    %c0_85 = arith.constant 0 : index
    %c0_86 = arith.constant 0 : index
    %179 = vector.load %arg7[%c1_84, %c0_85, %c0_86] : memref<2x1x64xf32, #tpu.memory_space<vmem>>, vector<1x1x64xf32>
    %180 = vector.shape_cast %179 : vector<1x1x64xf32> to vector<1x64xf32>
    %181 = vector.broadcast %180 : vector<1x64xf32> to vector<16x64xf32>
    %182 = arith.addf %178, %181 : vector<16x64xf32>
    %cst_87 = arith.constant 0.000000e+00 : f32
    %183 = vector.broadcast %cst_87 : f32 to vector<16x64xf32>
    %184 = arith.maximumf %182, %183 : vector<16x64xf32>
    %185 = arith.truncf %184 : vector<16x64xf32> to vector<16x64xbf16>
    %c1_88 = arith.constant 1 : index
    %c0_89 = arith.constant 0 : index
    %c0_90 = arith.constant 0 : index
    %186 = vector.load %arg8[%c1_88, %c0_89, %c0_90] : memref<2x64x32xbf16, #tpu.memory_space<vmem>>, vector<1x64x32xbf16>
    %187 = vector.shape_cast %186 : vector<1x64x32xbf16> to vector<64x32xbf16>
    %cst_91 = arith.constant dense<0.000000e+00> : vector<16x32xf32>
    %188 = tpu.matmul %185, %187, %cst_91 {dimension_numbers = #tpu.dot_dimension_numbers<[1], [0], [0], [1], [0, 0, 1, 1], [], []>} : vector<16x64xbf16>, vector<64x32xbf16>, vector<16x32xf32> -> vector<16x32xf32>
    %c1_92 = arith.constant 1 : index
    %c0_93 = arith.constant 0 : index
    %c0_94 = arith.constant 0 : index
    %189 = vector.load %arg9[%c1_92, %c0_93, %c0_94] : memref<2x1x32xf32, #tpu.memory_space<vmem>>, vector<1x1x32xf32>
    %190 = vector.shape_cast %189 : vector<1x1x32xf32> to vector<1x32xf32>
    %191 = vector.broadcast %190 : vector<1x32xf32> to vector<16x32xf32>
    %192 = arith.addf %188, %191 : vector<16x32xf32>
    %193 = arith.addf %192, %174 : vector<16x32xf32>
    %c1_95 = arith.constant 1 : index
    %c0_96 = arith.constant 0 : index
    %c0_97 = arith.constant 0 : index
    %194 = vector.load %arg10[%c1_95, %c0_96, %c0_97] : memref<2x1x32xf32, #tpu.memory_space<vmem>>, vector<1x1x32xf32>
    %195 = vector.shape_cast %194 : vector<1x1x32xf32> to vector<1x32xf32>
    %c1_98 = arith.constant 1 : index
    %c0_99 = arith.constant 0 : index
    %c0_100 = arith.constant 0 : index
    %196 = vector.load %arg11[%c1_98, %c0_99, %c0_100] : memref<2x1x32xf32, #tpu.memory_space<vmem>>, vector<1x1x32xf32>
    %197 = vector.shape_cast %196 : vector<1x1x32xf32> to vector<1x32xf32>
    %cst_101 = arith.constant dense<0.000000e+00> : vector<16xf32>
    %198 = vector.multi_reduction <add>, %193, %cst_101 [1] : vector<16x32xf32> to vector<16xf32>
    %199 = vector.shape_cast %198 : vector<16xf32> to vector<16x1xf32>
    %cst_102 = arith.constant 3.200000e+01 : f32
    %200 = vector.broadcast %cst_102 : f32 to vector<16x1xf32>
    %201 = arith.divf %199, %200 : vector<16x1xf32>
    %202 = vector.broadcast %201 : vector<16x1xf32> to vector<16x32xf32>
    %203 = arith.subf %193, %202 : vector<16x32xf32>
    %204 = arith.mulf %203, %203 : vector<16x32xf32>
    %cst_103 = arith.constant dense<0.000000e+00> : vector<16xf32>
    %205 = vector.multi_reduction <add>, %204, %cst_103 [1] : vector<16x32xf32> to vector<16xf32>
    %206 = vector.shape_cast %205 : vector<16xf32> to vector<16x1xf32>
    %cst_104 = arith.constant 3.200000e+01 : f32
    %207 = vector.broadcast %cst_104 : f32 to vector<16x1xf32>
    %208 = arith.divf %206, %207 : vector<16x1xf32>
    %209 = vector.broadcast %201 : vector<16x1xf32> to vector<16x32xf32>
    %210 = arith.subf %193, %209 : vector<16x32xf32>
    %cst_105 = arith.constant 9.99999974E-6 : f32
    %211 = vector.broadcast %cst_105 : f32 to vector<16x1xf32>
    %212 = arith.addf %208, %211 : vector<16x1xf32>
    %213 = math.rsqrt %212 : vector<16x1xf32>
    %214 = vector.broadcast %213 : vector<16x1xf32> to vector<16x32xf32>
    %215 = arith.mulf %210, %214 : vector<16x32xf32>
    %216 = vector.broadcast %195 : vector<1x32xf32> to vector<16x32xf32>
    %217 = arith.mulf %215, %216 : vector<16x32xf32>
    %218 = vector.broadcast %197 : vector<1x32xf32> to vector<16x32xf32>
    %219 = arith.addf %217, %218 : vector<16x32xf32>
    %220 = vector.shape_cast %219 : vector<16x32xf32> to vector<2x8x32xf32>
    %cst_106 = arith.constant dense<0.000000e+00> : vector<2x32xf32>
    %221 = vector.multi_reduction <add>, %220, %cst_106 [1] : vector<2x8x32xf32> to vector<2x32xf32>
    %cst_107 = arith.constant 8.000000e+00 : f32
    %222 = vector.broadcast %cst_107 : f32 to vector<2x32xf32>
    %223 = arith.divf %221, %222 : vector<2x32xf32>
    %224 = arith.truncf %223 : vector<2x32xf32> to vector<2x32xbf16>
    %c0_108 = arith.constant 0 : index
    %c0_109 = arith.constant 0 : index
    %225 = vector.load %arg12[%c0_108, %c0_109] : memref<32x8xbf16, #tpu.memory_space<vmem>>, vector<32x8xbf16>
    %cst_110 = arith.constant dense<0.000000e+00> : vector<2x8xf32>
    %226 = tpu.matmul %224, %225, %cst_110 {dimension_numbers = #tpu.dot_dimension_numbers<[1], [0], [0], [1], [0, 0, 1, 1], [], []>} : vector<2x32xbf16>, vector<32x8xbf16>, vector<2x8xf32> -> vector<2x8xf32>
    %c0_111 = arith.constant 0 : index
    %c0_112 = arith.constant 0 : index
    %227 = vector.load %arg13[%c0_111, %c0_112] : memref<1x8xf32, #tpu.memory_space<vmem>>, vector<1x8xf32>
    %228 = vector.broadcast %227 : vector<1x8xf32> to vector<2x8xf32>
    %229 = arith.addf %226, %228 : vector<2x8xf32>
    %cst_113 = arith.constant dense<0xFF800000> : vector<8xf32>
    %230 = vector.multi_reduction <maximumf>, %229, %cst_113 [0] : vector<2x8xf32> to vector<8xf32>
    %231 = vector.shape_cast %230 : vector<8xf32> to vector<1x8xf32>
    %232 = vector.broadcast %231 : vector<1x8xf32> to vector<2x8xf32>
    %233 = arith.subf %229, %232 : vector<2x8xf32>
    %234 = math.exp %233 : vector<2x8xf32>
    %cst_114 = arith.constant dense<0.000000e+00> : vector<8xf32>
    %235 = vector.multi_reduction <add>, %234, %cst_114 [0] : vector<2x8xf32> to vector<8xf32>
    %236 = vector.shape_cast %235 : vector<8xf32> to vector<1x8xf32>
    %237 = tpu.reciprocal %236 {approx = true} : vector<1x8xf32> -> vector<1x8xf32>
    %238 = vector.broadcast %237 : vector<1x8xf32> to vector<2x8xf32>
    %239 = arith.mulf %234, %238 : vector<2x8xf32>
    %c0_115 = arith.constant 0 : index
    %c0_116 = arith.constant 0 : index
    %240 = vector.load %arg14[%c0_115, %c0_116] : memref<2x8xf32, #tpu.memory_space<vmem>>, vector<2x8xf32>
    tpu.vector_store %arg14[%c0_115, %c0_116], %239 {strides = array<i32>} : memref<2x8xf32, #tpu.memory_space<vmem>>, vector<2x8xf32>,
    return
  }
}

</mosaic_0001>

<bundles_post_ra>
// kernel: tpu_custom_call.1
= control target key start
LH: loop header
LB: loop body
LE: loop exit
PB: predicated region body
PF: predicated region fallthrough
CT: control target
= control target key end

     0   :  { %19 = vsyncpa [#allocation3], 0  ;;  %s2292_s0 = inlined_call_operand.vmem [shape: f32[2,8,32], index: 0, kind: input, shape index: {}]   ;;  %s2293_s1 = inlined_call_operand.vmem [shape: bf16[2,32,96], index: 1, kind: input, shape index: {}]   ;;  %s2294_s2 = inlined_call_operand.vmem [shape: bf16[2,32,32], index: 2, kind: input, shape index: {}]   ;;  %s2295_s3 = inlined_call_operand.vmem [shape: f32[2,1,32], index: 3, kind: input, shape index: {}]   ;;  %s2296_s4 = inlined_call_operand.hbm [shape: f32[2,1,32], index: 4, kind: input, shape index: {}]   ;;  %s2297_s5 = inlined_call_operand.hbm [shape: f32[2,1,32], index: 5, kind: input, shape index: {}]   ;;  %s2298_s6 = inlined_call_operand.vmem [shape: bf16[2,32,64], index: 6, kind: input, shape index: {}]   ;;  %s2299_s7 = inlined_call_operand.hbm [shape: f32[2,1,64], index: 7, kind: input, shape index: {}]   ;;  %s2300_s8 = inlined_call_operand.vmem [shape: bf16[2,64,32], index: 8, kind: input, shape index: {}]   ;;  %s2301_s9 = inlined_call_operand.hbm [shape: f32[2,1,32], index: 9, kind: input, shape index: {}]   ;;  %s2302_s10 = inlined_call_operand.vmem [shape: f32[2,1,32], index: 10, kind: input, shape index: {}]   ;;  %s2303_s11 = inlined_call_operand.vmem [shape: f32[2,1,32], index: 11, kind: input, shape index: {}]   ;;  %s2304_s12 = inlined_call_operand.vmem [shape: bf16[32,8], index: 12, kind: input, shape index: {}]   ;;  %s2305_s13 = inlined_call_operand.vmem [shape: f32[1,8], index: 13, kind: input, shape index: {}]   ;;  %s2306_s14 = inlined_call_operand.hbm [shape: f32[2,8], index: 14, kind: output, shape index: {}]  }
   0x1   :  { %20 = vsyncpa [#allocation6], 0 }
   0x2   :  { %21 = vsyncpa [#allocation9], 0 }
   0x3   :  { %22 = vsyncpa [#allocation4], 0  ;;  %s1885_s29 = smov [#allocation5]   ;;  %s1886_s15 = smov [#allocation2]  }
   0x4   :  { %s48_s30 = sshll.u32 %s1885_s29, 4  ;;  %s36_s16 = sshll.u32 %s1886_s15, 4  ;;  %s49_s30 = int_to_ptr.vmem [resolvable:$true] %s48_s30  ;;  %s1971_s16 = int_to_ptr.vmem [resolvable:$true] %s36_s16 }
   0x5   :  { %s1767_s19 = scalar_lea.hbm %s2297_s5, 32 }
   0x6   :  { %p1768_p0 = scmp.ne.s32.totalorder %s2297_s5, %s1767_s19  ;;  %p1771_p1 = scmp.lt.u32.totalorder %s1767_s19, %s2297_s5 }
   0x8   :  { %p1773_p2 = pnand %p1771_p1, %p1768_p0 }
   0xa   :  { %1776 = shalt.err (!%p1773_p2)
}
   0xb   :  { %s1777_s24 = scalar_lea.vmem %s49_s30, 32  ;;  %p1782_p4 = scmp.lt.s32.totalorder %s49_s30, %s49_s30 }
   0xc   :  { %p1778_p3 = scmp.ne.s32.totalorder %s49_s30, %s1777_s24  ;;  %p1783_p5 = scmp.lt.s32.totalorder %s1777_s24, %s1777_s24 }
   0xe   :  { %p1784_p6 = por %p1783_p5, %p1782_p4 }
  0x10   :  { %p1785_p7 = pnand %p1784_p6, %p1778_p3 }
  0x12   :  { %1788 = shalt.err (!%p1785_p7)
}
  0x13   :  { %s1887_s25 = smov 16   ;;  %s1888_s26 = smov 1  }
  0x14   :  { %54 = dma.hbm_to_vmem [thread:$0]  %s2297_s5, 32, %s49_s30, [#allocation6], %s1887_s25, %s1887_s25, %s1888_s26  }
  0x15   :  { %s1789_s17 = scalar_lea.hbm %s2296_s4, 32 }
  0x16   :  { %p1790_p8 = scmp.ne.s32.totalorder %s2296_s4, %s1789_s17  ;;  %p1793_p9 = scmp.lt.u32.totalorder %s1789_s17, %s2296_s4 }
  0x18   :  { %p1795_p10 = pnand %p1793_p9, %p1790_p8 }
  0x1a   :  { %1798 = shalt.err (!%p1795_p10)
}
  0x1b   :  { %s1799_s22 = scalar_lea.vmem %s1971_s16, 32  ;;  %p1804_p12 = scmp.lt.s32.totalorder %s1971_s16, %s1971_s16 }
  0x1c   :  { %p1800_p11 = scmp.ne.s32.totalorder %s1971_s16, %s1799_s22  ;;  %p1805_p13 = scmp.lt.s32.totalorder %s1799_s22, %s1799_s22 }
  0x1e   :  { %p1806_p0 = por %p1805_p13, %p1804_p12 }
  0x20   :  { %p1807_p1 = pnand %p1806_p0, %p1800_p11 }
  0x22   :  { %1810 = shalt.err (!%p1807_p1)
}
  0x23   :  { %42 = dma.hbm_to_vmem [thread:$0]  %s2296_s4, 32, %s1971_s16, [#allocation3], %s1887_s25, %s1887_s25, %s1888_s26  }
  0x24   :  { %s1889_s23 = smov [#allocation7]   ;;  %s1890_s27 = smov [#allocation8]  }
  0x25   :  { %s62_s24 = sshll.u32 %s1889_s23, 4  ;;  %s76_s28 = sshll.u32 %s1890_s27, 4  ;;  %s63_s24 = int_to_ptr.vmem [resolvable:$true] %s62_s24  ;;  %s2008_s28 = int_to_ptr.vmem [resolvable:$true] %s76_s28 }
  0x26   :  { %s1811_s17 = scalar_lea.hbm %s2299_s7, 32 }
  0x27   :  { %p1812_p2 = scmp.ne.s32.totalorder %s2299_s7, %s1811_s17  ;;  %p1815_p3 = scmp.lt.u32.totalorder %s1811_s17, %s2299_s7 }
  0x29   :  { %p1817_p4 = pnand %p1815_p3, %p1812_p2 }
  0x2b   :  { %1820 = shalt.err (!%p1817_p4)
}
  0x2c   :  { %s1821_s4 = scalar_lea.vmem %s63_s24, 32  ;;  %p1826_p6 = scmp.lt.s32.totalorder %s63_s24, %s63_s24 }
  0x2d   :  { %p1822_p5 = scmp.ne.s32.totalorder %s63_s24, %s1821_s4  ;;  %p1827_p7 = scmp.lt.s32.totalorder %s1821_s4, %s1821_s4 }
  0x2f   :  { %p1828_p8 = por %p1827_p7, %p1826_p6 }
  0x31   :  { %p1829_p9 = pnand %p1828_p8, %p1822_p5 }
  0x33   :  { %1832 = shalt.err (!%p1829_p9)
}
  0x34   :  { %68 = dma.hbm_to_vmem [thread:$0]  %s2299_s7, 32, %s63_s24, [#allocation6], %s1887_s25, %s1887_s25, %s1888_s26  }
  0x35   :  { %s1833_s23 = scalar_lea.hbm %s2301_s9, 32 }
  0x36   :  { %p1834_p10 = scmp.ne.s32.totalorder %s2301_s9, %s1833_s23  ;;  %p1837_p11 = scmp.lt.u32.totalorder %s1833_s23, %s2301_s9 }
  0x38   :  { %p1839_p12 = pnand %p1837_p11, %p1834_p10 }
  0x3a   :  { %1842 = shalt.err (!%p1839_p12)
}
  0x3b   :  { %s1843_s18 = scalar_lea.vmem %s2008_s28, 32  ;;  %p1848_p0 = scmp.lt.s32.totalorder %s2008_s28, %s2008_s28 }
  0x3c   :  { %p1844_p13 = scmp.ne.s32.totalorder %s2008_s28, %s1843_s18  ;;  %p1849_p1 = scmp.lt.s32.totalorder %s1843_s18, %s1843_s18 }
  0x3e   :  { %p1850_p2 = por %p1849_p1, %p1848_p0 }
  0x40   :  { %p1851_p3 = pnand %p1850_p2, %p1844_p13 }
  0x42   :  { %1854 = shalt.err (!%p1851_p3)
}
  0x43   :  { %82 = dma.hbm_to_vmem [thread:$0]  %s2301_s9, 32, %s2008_s28, [#allocation9], %s1887_s25, %s1887_s25, %s1888_s26  }
  0x44   :  { %1877 = dma.done.wait [#allocation3], 32  }
  0x45   :  { %1878 = vsyncadd [#allocation3], 4294967264 }
  0x46   :  { %1879 = dma.done.wait [#allocation6], 64  }
  0x47   :  { %1880 = vsyncadd [#allocation6], 4294967232 }
  0x48   :  { %1881 = dma.done.wait [#allocation9], 32  }
  0x49   :  { %1882 = vsyncadd [#allocation9], 4294967264  ;;  %v1891_v0 = vmov 0.0   ;;  %vm1892_vm0 = vmmov 0   ;;  %v1709_v1 = vld [vmem:[%s2293_s1] sm:$0xff]   ;;  %v1710_v2 = vld [vmem:[%s2293_s1 + $0x8] sm:$0xff]  }
  0x4a   :  { %1570 = vmatprep.subr.bf16.mxu0 %v1891_v0  ;;  %1574 = vmatprep.mubr.msk.bf16.mxu0 %vm1892_vm0, %v1891_v0  ;;  %v2060_v3 = vld [vmem:[%s2292_s0] sm:$0xff]  ;;  %v2065_v4 = vld [vmem:[%s2292_s0 + $0x8] sm:$0xff]  ;;  %vm123_vm1 = vcmask 261120   ;;  %s1893_s0 = smov 96   ;;  %vm270_vm2 = vcmask 64512   ;;  %s1894_s16 = smov 64  }
  0x4b   :  { %1578 = vmatprep.subr.bf16.mxu1 %v1891_v0  ;;  %1580 = vmatprep.mubr.msk.bf16.mxu1 %vm1892_vm0, %v1891_v0  ;;  %v106_v5 = vpack.c.bf16 %v2065_v4, %v2060_v3  ;;  %vm300_vm3 = vcmask 1043456   ;;  %v1711_v50 = vld [vmem:[%s2294_s2] sm:$0xff]   ;;  %v1712_v51 = vld [vmem:[%s2294_s2 + $0x8] sm:$0xff]   ;;  %vm617_vm4 = vcmask 523264   ;;  %vm1350_vm5 = vcmask 1041409  }
  0x4c   :  { %1571 = vmatpush3.bf16.msra.mxu0 %v1709_v1  ;;  %v1453_v61 = vld [vmem:[%s2295_s3] ss:$0 sm:$0xff]  ;;  %vm1408_vm6 = vcmask 58368  }
  0x4d   :  { %1572 = vmatprep.subr.bf16.mxu0 %v1891_v0 }
  0x50   :  { %1573 = vmatpush3.bf16.msra.mxu0 %v1710_v2 }
  0x51   :  { %1584 = vmatprep.subr.bf16.mxu0 %v1891_v0 }
  0x53   :  { %1575 = vmatmul.mubr.msk.bf16.vlgmr.msra.gmra.mrb[0].mxu0 %vm123_vm1, %v106_v5 }
  0x54   :  { %1586 = vmatprep.mubr.msk.bf16.mxu0 %vm1892_vm0, %v1891_v0 }
 0x126   :  { %v161_v6 = vpop.f32.mrb[0].mxu0 }
 0x127   :  { %v168_v7 = vpack.c.bf16 %v161_v6, %v161_v6  ;;  %v1576_v8 = vpop.f32.mrb[1].mxu0 }
 0x128   :  { %v164_v9 = vpop.f32.mrb[2].mxu0 }
 0x129   :  { %171 = vrot.lane.b32.xlu0 %v168_v7, %s1893_s0  ;;  %v1577_v10 = vpop.f32.mrb[3].mxu0  ;;  %v169_v11 = vpack.c.bf16 %v164_v9, %v164_v9 }
 0x12d   :  { %220 = vrot.lane.b32.xlu0 %v169_v11, %s1893_s0 }
 0x19b   :  { %v172_v12 = vpop.permute.xlu0 %171 }
 0x19c   :  { %v177_v13 = vsel %vm123_vm1, %v172_v12, 0 }
 0x19d   :  { %1579 = vmatpush3.bf16.xpose.msra.mxu1 %v177_v13 }
 0x19e   :  { %1590 = vmatprep.subr.bf16.mxu1 %v1891_v0 }
 0x19f   :  { %v221_v14 = vpop.permute.xlu0 %220 }
 0x1a0   :  { %v226_v15 = vsel %vm123_vm1, %v221_v14, 0 }
 0x1a1   :  { %1585 = vmatpush3.bf16.xpose.msra.mxu0 %v226_v15 }
 0x1a2   :  { %1596 = vmatprep.subr.bf16.mxu0 %v1891_v0 }
 0x1a4   :  { %1581 = vmatmul.mubr.msk.bf16.vlgmr.msra.gmra.mrb[0].mxu1 %vm123_vm1, %v168_v7 }
 0x1a5   :  { %1592 = vmatprep.mubr.msk.bf16.mxu1 %vm1892_vm0, %v1891_v0 }
 0x1a8   :  { %1587 = vmatmul.mubr.msk.bf16.vlgmr.msra.gmra.mrb[4].mxu0 %vm123_vm1, %v169_v11 }
 0x1a9   :  { %1598 = vmatprep.mubr.msk.bf16.mxu0 %vm1892_vm0, %v1891_v0 }
 0x277   :  { %v213_v16 = vpop.f32.mrb[0].mxu1 }
 0x278   :  { %v268_v17 = vmul.f32 0.17677669, %v213_v16  ;;  %v1582_v18 = vpop.f32.mrb[1].mxu1 }
 0x279   :  { %v216_v19 = vpop.f32.mrb[2].mxu1 }
 0x27a   :  { %v1583_v20 = vpop.f32.mrb[3].mxu1  ;;  %v271_v21 = vsel %vm270_vm2, %v268_v17, -inf }
 0x27b   :  { %272 = vmax.xlane.f32.xlu1 %v271_v21  ;;  %v262_v22 = vpop.f32.mrb[4].mxu0  ;;  %v1714_v20 = vld [vmem:[%s2298_s6 + $0x8] sm:$0xff]   ;;  %v1715_v21 = vld [vmem:[%s2300_s8] sm:$0xff]  }
 0x27c   :  { %v269_v23 = vmul.f32 0.17677669, %v262_v22  ;;  %v1588_v24 = vpop.f32.mrb[5].mxu0  ;;  %v1716_v22 = vld [vmem:[%s2300_s8 + $0x8] sm:$0xff]  }
 0x27d   :  { %v265_v25 = vpop.f32.mrb[6].mxu0 }
 0x27e   :  { %v1589_v26 = vpop.f32.mrb[7].mxu0  ;;  %v274_v27 = vsel %vm270_vm2, %v269_v23, -inf }
 0x27f   :  { %275 = vmax.xlane.f32.xlu1 %v274_v27 }
 0x290   :  { %295 = vrot.lane.b32.xlu1 %v168_v7, %s1894_s16 }
 0x308   :  { %v273_v28 = vpop.xlane.xlu1 %272 }
 0x309   :  { %v277_v29 = vsub.f32 %v268_v17, %v273_v28 }
 0x30b   :  { %v279_v30 = vmul.f32 1.442695, %v277_v29 }
 0x30c   :  { %v276_v31 = vpop.xlane.xlu1 %275 }
 0x30d   :  { %1731 = vpow2.f32 %v279_v30  ;;  %v278_v32 = vsub.f32 %v269_v23, %v276_v31  ;;  %v1457_v31 = vld [vmem:[#allocation2] ss:$0 sm:$0xff] }
 0x30f   :  { %v281_v33 = vmul.f32 1.442695, %v278_v32 }
 0x310   :  { %v296_v34 = vpop.permute.xlu1 %295 }
 0x311   :  { %1733 = vpow2.f32 %v281_v33  ;;  %v302_v35 = vsel %vm300_vm3, %v296_v34, 0 }
 0x312   :  { %1591 = vmatpush3.bf16.msra.mxu1 %v302_v35  ;;  %v1458_v35 = vld [vmem:[#allocation5] ss:$0 sm:$0xff] }
 0x313   :  { %1602 = vmatprep.subr.bf16.mxu1 %v1891_v0 }
 0x317   :  { %v1732_v36 = vpop.eup %1731 }
 0x318   :  { %v283_v37 = vsel %vm270_vm2, %v1732_v36, 0.0 }
 0x319   :  { %284 = vadd.xlane.f32.xlu0 %v283_v37 }
 0x31b   :  { %v1734_v38 = vpop.eup %1733 }
 0x31c   :  { %v286_v39 = vsel %vm270_vm2, %v1734_v38, 0.0 }
 0x31d   :  { %287 = vadd.xlane.f32.xlu1 %v286_v39 }
 0x32e   :  { %344 = vrot.lane.b32.xlu1 %v169_v11, %s1894_s16 }
 0x3a6   :  { %v285_v40 = vpop.xlane.xlu0 %284 }
 0x3a7   :  { %1735 = vrcp.f32 %v285_v40  ;;  %v1717_v40 = vld [vmem:[%s2300_s8 + $0x10] sm:$0xff]  }
 0x3aa   :  { %v288_v41 = vpop.xlane.xlu1 %287 }
 0x3ab   :  { %1737 = vrcp.f32 %v288_v41  ;;  %v1718_v41 = vld [vmem:[%s2300_s8 + $0x18] sm:$0xff]  }
 0x3ae   :  { %v345_v42 = vpop.permute.xlu1 %344 }
 0x3af   :  { %v350_v43 = vsel %vm300_vm3, %v345_v42, 0  ;;  %v1459_v42 = vld [vmem:[#allocation7] ss:$0 sm:$0xff] }
 0x3b0   :  { %1597 = vmatpush3.bf16.msra.mxu0 %v350_v43 }
 0x3b1   :  { %v1736_v44 = vpop.eup %1735  ;;  %1610 = vmatprep.subr.bf16.mxu0 %v1891_v0 }
 0x3b2   :  { %v291_v45 = vmul.f32 %v1736_v44, %v1732_v36 }
 0x3b4   :  { %v293_v46 = vpack.c.bf16 %v291_v45, %v291_v45 }
 0x3b5   :  { %v1738_v47 = vpop.eup %1737 }
 0x3b6   :  { %v292_v48 = vmul.f32 %v1738_v47, %v1734_v38  ;;  %1593 = vmatmul.mubr.msk.bf16.vlgmr.msra.gmra.mrb[4].mxu1 %vm270_vm2, %v293_v46 }
 0x3b7   :  { %1606 = vmatprep.mubr.msk.bf16.mxu1 %vm1892_vm0, %v1891_v0  ;;  %1603 = vmatpush3.bf16.msra.mxu1 %v1711_v50 }
 0x3b8   :  { %v294_v49 = vpack.c.bf16 %v292_v48, %v292_v48  ;;  %1604 = vmatprep.subr.bf16.mxu1 %v1891_v0 }
 0x3ba   :  { %1599 = vmatmul.mubr.msk.bf16.vlgmr.msra.gmra.mrb[8].mxu0 %vm270_vm2, %v294_v49 }
 0x3bb   :  { %1614 = vmatprep.mubr.msk.bf16.mxu0 %vm1892_vm0, %v1891_v0  ;;  %1605 = vmatpush3.bf16.msra.mxu1 %v1712_v51 }
 0x3bc   :  { %1618 = vmatprep.subr.bf16.mxu1 %v1891_v0 }
 0x489   :  { %v338_v52 = vpop.f32.mrb[4].mxu1 }
 0x48a   :  { %v1594_v53 = vpop.f32.mrb[5].mxu1 }
 0x48b   :  { %v341_v54 = vpop.f32.mrb[6].mxu1 }
 0x48c   :  { %v1595_v55 = vpop.f32.mrb[7].mxu1 }
 0x48d   :  { %v386_v56 = vpop.f32.mrb[8].mxu0 }
 0x48e   :  { %v392_v57 = vpack.c.bf16 %v386_v56, %v338_v52  ;;  %v1600_v58 = vpop.f32.mrb[9].mxu0  ;;  %v1463_v52 = vld [vmem:[#allocation8] ss:$0 sm:$0xff] }
 0x48f   :  { %v389_v59 = vpop.f32.mrb[10].mxu0 }
 0x490   :  { %v1601_v60 = vpop.f32.mrb[11].mxu0  ;;  %1607 = vmatmul.mubr.msk.bf16.vlgmr.msra.gmra.mrb[8].mxu1 %vm123_vm1, %v392_v57 }
 0x491   :  { %1626 = vmatprep.mubr.msk.bf16.mxu1 %vm1892_vm0, %v1891_v0  ;;  %1619 = vmatpush3.bf16.msra.mxu1 %v1715_v21 }
 0x492   :  { %1620 = vmatprep.subr.bf16.mxu1 %v1891_v0 }
 0x495   :  { %1621 = vmatpush3.bf16.msra.mxu1 %v1716_v22 }
 0x496   :  { %1622 = vmatprep.subr.bf16.mxu1 %v1891_v0 }
 0x499   :  { %1623 = vmatpush3.bf16.msra.mxu1 %v1717_v40 }
 0x49a   :  { %1624 = vmatprep.subr.bf16.mxu1 %v1891_v0 }
 0x49d   :  { %1625 = vmatpush3.bf16.msra.mxu1 %v1718_v41 }
 0x49e   :  { %1644 = vmatprep.subr.bf16.mxu1 %v1891_v0 }
 0x563   :  { %v453_v62 = vpop.f32.mrb[8].mxu1 }
 0x564   :  { %v454_v63 = vadd.f32 %v1453_v61, %v453_v62  ;;  %v1608_v1 = vpop.f32.mrb[9].mxu1 }
 0x565   :  { %v456_v2 = vpop.f32.mrb[10].mxu1 }
 0x566   :  { %v457_v5 = vadd.f32 %v1453_v61, %v456_v2  ;;  %v1609_v6 = vpop.f32.mrb[11].mxu1  ;;  %v460_v7 = vadd.f32 %v454_v63, %v2060_v3 }
 0x568   :  { %v464_v8 = vsel %vm123_vm1, %v460_v7, 0.0  ;;  %v461_v9 = vadd.f32 %v457_v5, %v2065_v4  ;;  %v1713_v4 = vld [vmem:[%s2298_s6] sm:$0xff]  }
 0x569   :  { %465 = vadd.xlane.f32.xlu1 %v464_v8  ;;  %1611 = vmatpush3.bf16.msra.mxu0 %v1713_v4 }
 0x56a   :  { %v467_v10 = vsel %vm123_vm1, %v461_v9, 0.0  ;;  %1612 = vmatprep.subr.bf16.mxu0 %v1891_v0 }
 0x56b   :  { %468 = vadd.xlane.f32.xlu0 %v467_v10 }
 0x56d   :  { %1613 = vmatpush3.bf16.msra.mxu0 %v1714_v20  ;;  %v1469_v20 = vld [vmem:[%s2302_s10] ss:$0 sm:$0xff] }
 0x56e   :  { %1630 = vmatprep.subr.bf16.mxu0 %v1891_v0 }
 0x5f6   :  { %v466_v11 = vpop.xlane.xlu1 %465 }
 0x5f7   :  { %v471_v12 = vmul.f32 0.03125, %v466_v11 }
 0x5f8   :  { %v469_v13 = vpop.xlane.xlu0 %468 }
 0x5f9   :  { %v473_v14 = vsub.f32 %v460_v7, %v471_v12  ;;  %v472_v15 = vmul.f32 0.03125, %v469_v13  ;;  %v1719_v12 = vld [vmem:[%s2293_s1 + $0x10] sm:$0xff]   ;;  %v1720_v13 = vld [vmem:[%s2293_s1 + $0x18] sm:$0xff]  }
 0x5fb   :  { %v474_v16 = vsub.f32 %v461_v9, %v472_v15  ;;  %v475_v17 = vmul.f32 %v473_v14, %v473_v14 }
 0x5fd   :  { %v477_v18 = vsel %vm123_vm1, %v475_v17, 0.0  ;;  %v476_v19 = vmul.f32 %v474_v16, %v474_v16 }
 0x5fe   :  { %478 = vadd.xlane.f32.xlu0 %v477_v18 }
 0x5ff   :  { %v480_v3 = vsel %vm123_vm1, %v476_v19, 0.0 }
 0x602   :  { %481 = vadd.xlane.f32.xlu0 %v480_v3 }
 0x68b   :  { %v479_v23 = vpop.xlane.xlu0 %478 }
 0x68c   :  { %v483_v24 = vmul.f32 0.03125, %v479_v23 }
 0x68e   :  { %v485_v25 = vadd.f32 1e-05, %v483_v24  ;;  %v1470_v24 = vld [vmem:[%s2303_s11] ss:$0 sm:$0xff] }
 0x68f   :  { %v482_v26 = vpop.xlane.xlu0 %481 }
 0x690   :  { %1739 = vrsqrt.f32 %v485_v25  ;;  %v484_v27 = vmul.f32 0.03125, %v482_v26 }
 0x692   :  { %v486_v28 = vadd.f32 1e-05, %v484_v27 }
 0x694   :  { %1741 = vrsqrt.f32 %v486_v28 }
 0x69a   :  { %v1740_v29 = vpop.eup %1739 }
 0x69b   :  { %v489_v30 = vmul.f32 %v1740_v29, %v473_v14 }
 0x69d   :  { %v497_v33 = vmul.f32 %v1457_v31, %v489_v30 }
 0x69e   :  { %v1742_v32 = vpop.eup %1741 }
 0x69f   :  { %v490_v34 = vmul.f32 %v1742_v32, %v474_v16  ;;  %v505_v37 = vadd.f32 %v1458_v35, %v497_v33 }
 0x6a1   :  { %v498_v36 = vmul.f32 %v1457_v31, %v490_v34 }
 0x6a3   :  { %v506_v38 = vadd.f32 %v1458_v35, %v498_v36 }
 0x6a5   :  { %v507_v39 = vpack.c.bf16 %v506_v38, %v505_v37 }
 0x6a7   :  { %1615 = vmatmul.mubr.msk.bf16.vlgmr.msra.gmra.mrb[12].mxu0 %vm123_vm1, %v507_v39 }
 0x6a8   :  { %1634 = vmatprep.mubr.msk.bf16.mxu0 %vm1892_vm0, %v1891_v0  ;;  %1631 = vmatpush3.bf16.msra.mxu0 %v1719_v12 }
 0x6a9   :  { %1632 = vmatprep.subr.bf16.mxu0 %v1891_v0 }
 0x6ac   :  { %1633 = vmatpush3.bf16.msra.mxu0 %v1720_v13  ;;  %v1722_v13 = vld [vmem:[%s2294_s2 + $0x18] sm:$0xff]  }
 0x6ad   :  { %1638 = vmatprep.subr.bf16.mxu0 %v1891_v0 }
 0x77a   :  { %v568_v43 = vpop.f32.mrb[12].mxu0 }
 0x77b   :  { %v569_v44 = vadd.f32 %v1459_v42, %v568_v43  ;;  %v1616_v45 = vpop.f32.mrb[13].mxu0 }
 0x77c   :  { %v571_v46 = vpop.f32.mrb[14].mxu0 }
 0x77d   :  { %v572_v47 = vadd.f32 %v1459_v42, %v571_v46  ;;  %v1617_v48 = vpop.f32.mrb[15].mxu0  ;;  %v575_v49 = vmax.f32 %v569_v44, 0.0 }
 0x77f   :  { %v576_v50 = vmax.f32 %v572_v47, 0.0 }
 0x781   :  { %v577_v51 = vpack.c.bf16 %v576_v50, %v575_v49 }
 0x783   :  { %1627 = vmatmul.mubr.msk.bf16.vlgmr.msra.gmra.mrb[12].mxu1 %vm617_vm4, %v577_v51 }
 0x784   :  { %1646 = vmatprep.mubr.msk.bf16.mxu1 %vm1892_vm0, %v1891_v0 }
 0x856   :  { %v655_v53 = vpop.f32.mrb[12].mxu1 }
 0x857   :  { %v656_v54 = vadd.f32 %v1463_v52, %v655_v53  ;;  %v1628_v55 = vpop.f32.mrb[13].mxu1 }
 0x858   :  { %v658_v56 = vpop.f32.mrb[14].mxu1 }
 0x859   :  { %v659_v57 = vadd.f32 %v1463_v52, %v658_v56  ;;  %v1629_v58 = vpop.f32.mrb[15].mxu1  ;;  %v662_v59 = vadd.f32 %v656_v54, %v505_v37 }
 0x85b   :  { %v666_v60 = vsel %vm123_vm1, %v662_v59, 0.0  ;;  %v663_v61 = vadd.f32 %v659_v57, %v506_v38 }
 0x85c   :  { %667 = vadd.xlane.f32.xlu0 %v666_v60 }
 0x85d   :  { %v669_v62 = vsel %vm123_vm1, %v663_v61, 0.0 }
 0x860   :  { %670 = vadd.xlane.f32.xlu0 %v669_v62 }
 0x8e9   :  { %v668_v63 = vpop.xlane.xlu0 %667 }
 0x8ea   :  { %v672_v1 = vmul.f32 0.03125, %v668_v63 }
 0x8ec   :  { %v674_v2 = vsub.f32 %v662_v59, %v672_v1 }
 0x8ed   :  { %v671_v5 = vpop.xlane.xlu0 %670 }
 0x8ee   :  { %v673_v6 = vmul.f32 0.03125, %v671_v5  ;;  %v676_v7 = vmul.f32 %v674_v2, %v674_v2 }
 0x8f0   :  { %v675_v8 = vsub.f32 %v663_v61, %v673_v6  ;;  %v678_v9 = vsel %vm123_vm1, %v676_v7, 0.0 }
 0x8f1   :  { %679 = vadd.xlane.f32.xlu0 %v678_v9  ;;  %v1721_v9 = vld [vmem:[%s2294_s2 + $0x10] sm:$0xff]  }
 0x8f2   :  { %v677_v10 = vmul.f32 %v675_v8, %v675_v8 }
 0x8f4   :  { %v681_v11 = vsel %vm123_vm1, %v677_v10, 0.0 }
 0x8f5   :  { %682 = vadd.xlane.f32.xlu0 %v681_v11 }
 0x97e   :  { %v680_v14 = vpop.xlane.xlu0 %679 }
 0x97f   :  { %v684_v15 = vmul.f32 0.03125, %v680_v14 }
 0x981   :  { %v686_v16 = vadd.f32 1e-05, %v684_v15 }
 0x982   :  { %v683_v17 = vpop.xlane.xlu0 %682 }
 0x983   :  { %1743 = vrsqrt.f32 %v686_v16  ;;  %v685_v18 = vmul.f32 0.03125, %v683_v17 }
 0x985   :  { %v687_v19 = vadd.f32 1e-05, %v685_v18 }
 0x987   :  { %1745 = vrsqrt.f32 %v687_v19 }
 0x98d   :  { %v1744_v3 = vpop.eup %1743 }
 0x98e   :  { %v690_v4 = vmul.f32 %v1744_v3, %v674_v2 }
 0x990   :  { %v698_v22 = vmul.f32 %v1469_v20, %v690_v4 }
 0x991   :  { %v1746_v21 = vpop.eup %1745 }
 0x992   :  { %v691_v23 = vmul.f32 %v1746_v21, %v675_v8  ;;  %v2170_v26 = vadd.f32 %v1470_v24, %v698_v22  ;;  %v1487_v21 = vld [vmem:[%s2295_s3 + $0x1] ss:$0 sm:$0xff] }
 0x994   :  { %v699_v25 = vmul.f32 %v1469_v20, %v691_v23 }
 0x996   :  { %v2172_v27 = vadd.f32 %v1470_v24, %v699_v25 }
 0x998   :  { %v708_v28 = vpack.c.bf16 %v2172_v27, %v2170_v26 }
 0x99a   :  { %1635 = vmatmul.mubr.msk.bf16.vlgmr.msra.gmra.mrb[16].mxu0 %vm123_vm1, %v708_v28 }
 0x99b   :  { %1640 = vmatprep.mubr.msk.bf16.mxu0 %vm1892_vm0, %v1891_v0 }
 0xa6d   :  { %v763_v29 = vpop.f32.mrb[16].mxu0 }
 0xa6e   :  { %v770_v30 = vpack.c.bf16 %v763_v29, %v763_v29  ;;  %v1636_v31 = vpop.f32.mrb[17].mxu0 }
 0xa6f   :  { %v766_v32 = vpop.f32.mrb[18].mxu0 }
 0xa70   :  { %v771_v33 = vpack.c.bf16 %v766_v32, %v766_v32  ;;  %773 = vrot.lane.b32.xlu0 %v770_v30, %s1893_s0  ;;  %v1637_v34 = vpop.f32.mrb[19].mxu0 }
 0xa72   :  { %822 = vrot.lane.b32.xlu1 %v771_v33, %s1893_s0 }
 0xae2   :  { %v774_v35 = vpop.permute.xlu0 %773 }
 0xae3   :  { %v779_v36 = vsel %vm123_vm1, %v774_v35, 0 }
 0xae4   :  { %1639 = vmatpush3.bf16.xpose.msra.mxu0 %v779_v36  ;;  %v823_v37 = vpop.permute.xlu1 %822 }
 0xae5   :  { %v828_v38 = vsel %vm123_vm1, %v823_v37, 0  ;;  %1650 = vmatprep.subr.bf16.mxu0 %v1891_v0 }
 0xae6   :  { %1645 = vmatpush3.bf16.xpose.msra.mxu1 %v828_v38 }
 0xae7   :  { %1656 = vmatprep.subr.bf16.mxu1 %v1891_v0 }
 0xaeb   :  { %1641 = vmatmul.mubr.msk.bf16.vlgmr.msra.gmra.mrb[20].mxu0 %vm123_vm1, %v770_v30 }
 0xaec   :  { %1652 = vmatprep.mubr.msk.bf16.mxu0 %vm1892_vm0, %v1891_v0 }
 0xaed   :  { %1647 = vmatmul.mubr.msk.bf16.vlgmr.msra.gmra.mrb[16].mxu1 %vm123_vm1, %v771_v33 }
 0xaee   :  { %1658 = vmatprep.mubr.msk.bf16.mxu1 %vm1892_vm0, %v1891_v0 }
 0xbbe   :  { %v815_v39 = vpop.f32.mrb[20].mxu0 }
 0xbbf   :  { %v870_v40 = vmul.f32 0.17677669, %v815_v39  ;;  %v1642_v41 = vpop.f32.mrb[21].mxu0 }
 0xbc0   :  { %v818_v42 = vpop.f32.mrb[22].mxu0  ;;  %v864_v43 = vpop.f32.mrb[16].mxu1 }
 0xbc1   :  { %v871_v44 = vmul.f32 0.17677669, %v864_v43  ;;  %v1643_v45 = vpop.f32.mrb[23].mxu0  ;;  %v1648_v46 = vpop.f32.mrb[17].mxu1  ;;  %v872_v47 = vsel %vm270_vm2, %v870_v40, -inf  ;;  %v1724_v43 = vld [vmem:[%s2298_s6 + $0x18] sm:$0xff]  }
 0xbc2   :  { %v867_v48 = vpop.f32.mrb[18].mxu1  ;;  %873 = vmax.xlane.f32.xlu1 %v872_v47  ;;  %v1726_v45 = vld [vmem:[%s2300_s8 + $0x28] sm:$0xff]  }
 0xbc3   :  { %v1649_v49 = vpop.f32.mrb[19].mxu1  ;;  %v875_v50 = vsel %vm270_vm2, %v871_v44, -inf }
 0xbc4   :  { %876 = vmax.xlane.f32.xlu0 %v875_v50 }
 0xc4f   :  { %v874_v51 = vpop.xlane.xlu1 %873 }
 0xc50   :  { %v878_v52 = vsub.f32 %v870_v40, %v874_v51 }
 0xc51   :  { %v877_v53 = vpop.xlane.xlu0 %876 }
 0xc52   :  { %v880_v54 = vmul.f32 1.442695, %v878_v52  ;;  %v879_v55 = vsub.f32 %v871_v44, %v877_v53  ;;  %v1725_v44 = vld [vmem:[%s2300_s8 + $0x20] sm:$0xff]  }
 0xc53   :  { %v1491_v53 = vld [vmem:[#allocation2 + $0x1] ss:$0 sm:$0xff] }
 0xc54   :  { %1747 = vpow2.f32 %v880_v54  ;;  %v882_v56 = vmul.f32 1.442695, %v879_v55 }
 0xc56   :  { %1749 = vpow2.f32 %v882_v56 }
 0xc5e   :  { %v1748_v57 = vpop.eup %1747 }
 0xc5f   :  { %v884_v58 = vsel %vm270_vm2, %v1748_v57, 0.0 }
 0xc60   :  { %v1750_v59 = vpop.eup %1749  ;;  %885 = vadd.xlane.f32.xlu0 %v884_v58  ;;  %v1492_v58 = vld [vmem:[#allocation5 + $0x1] ss:$0 sm:$0xff] }
 0xc61   :  { %v887_v60 = vsel %vm270_vm2, %v1750_v59, 0.0 }
 0xc62   :  { %888 = vadd.xlane.f32.xlu1 %v887_v60 }
 0xc73   :  { %944 = vrot.lane.b32.xlu1 %v771_v33, %s1894_s16 }
 0xc76   :  { %896 = vrot.lane.b32.xlu0 %v770_v30, %s1894_s16 }
 0xced   :  { %v886_v61 = vpop.xlane.xlu0 %885 }
 0xcee   :  { %1751 = vrcp.f32 %v886_v61 }
 0xcef   :  { %v889_v62 = vpop.xlane.xlu1 %888 }
 0xcf0   :  { %1753 = vrcp.f32 %v889_v62 }
 0xcf1   :  { %v897_v63 = vpop.permute.xlu0 %896 }
 0xcf2   :  { %v902_v1 = vsel %vm300_vm3, %v897_v63, 0  ;;  %v1727_v63 = vld [vmem:[%s2300_s8 + $0x30] sm:$0xff]  }
 0xcf3   :  { %1651 = vmatpush3.bf16.msra.mxu0 %v902_v1  ;;  %v945_v2 = vpop.permute.xlu1 %944  ;;  %v1728_v1 = vld [vmem:[%s2300_s8 + $0x38] sm:$0xff]  }
 0xcf4   :  { %v950_v5 = vsel %vm300_vm3, %v945_v2, 0  ;;  %1662 = vmatprep.subr.bf16.mxu0 %v1891_v0  ;;  %v1497_v2 = vld [vmem:[#allocation7 + $0x1] ss:$0 sm:$0xff] }
 0xcf5   :  { %1657 = vmatpush3.bf16.msra.mxu1 %v950_v5 }
 0xcf6   :  { %1670 = vmatprep.subr.bf16.mxu1 %v1891_v0 }
 0xcf8   :  { %v1752_v6 = vpop.eup %1751 }
 0xcf9   :  { %v892_v7 = vmul.f32 %v1752_v6, %v1748_v57 }
 0xcfa   :  { %v1754_v8 = vpop.eup %1753 }
 0xcfb   :  { %v893_v10 = vmul.f32 %v1754_v8, %v1750_v59  ;;  %v894_v11 = vpack.c.bf16 %v892_v7, %v892_v7 }
 0xcfd   :  { %1653 = vmatmul.mubr.msk.bf16.vlgmr.msra.gmra.mrb[24].mxu0 %vm270_vm2, %v894_v11  ;;  %v895_v12 = vpack.c.bf16 %v893_v10, %v893_v10 }
 0xcfe   :  { %1663 = vmatpush3.bf16.msra.mxu0 %v1721_v9  ;;  %1666 = vmatprep.mubr.msk.bf16.mxu0 %vm1892_vm0, %v1891_v0 }
 0xcff   :  { %1659 = vmatmul.mubr.msk.bf16.vlgmr.msra.gmra.mrb[20].mxu1 %vm270_vm2, %v895_v12  ;;  %1664 = vmatprep.subr.bf16.mxu0 %v1891_v0 }
 0xd00   :  { %1674 = vmatprep.mubr.msk.bf16.mxu1 %vm1892_vm0, %v1891_v0 }
 0xd02   :  { %1665 = vmatpush3.bf16.msra.mxu0 %v1722_v13 }
 0xd03   :  { %1678 = vmatprep.subr.bf16.mxu0 %v1891_v0 }
 0xdd0   :  { %v938_v14 = vpop.f32.mrb[24].mxu0 }
 0xdd1   :  { %v1654_v15 = vpop.f32.mrb[25].mxu0 }
 0xdd2   :  { %v941_v16 = vpop.f32.mrb[26].mxu0  ;;  %v986_v17 = vpop.f32.mrb[20].mxu1 }
 0xdd3   :  { %v992_v18 = vpack.c.bf16 %v986_v17, %v938_v14  ;;  %v1655_v19 = vpop.f32.mrb[27].mxu0  ;;  %v1660_v3 = vpop.f32.mrb[21].mxu1  ;;  %v1509_v14 = vld [vmem:[#allocation8 + $0x1] ss:$0 sm:$0xff] }
 0xdd4   :  { %v989_v4 = vpop.f32.mrb[22].mxu1 }
 0xdd5   :  { %v1661_v20 = vpop.f32.mrb[23].mxu1  ;;  %1667 = vmatmul.mubr.msk.bf16.vlgmr.msra.gmra.mrb[28].mxu0 %vm123_vm1, %v992_v18 }
 0xdd6   :  { %1686 = vmatprep.mubr.msk.bf16.mxu0 %vm1892_vm0, %v1891_v0  ;;  %1679 = vmatpush3.bf16.msra.mxu0 %v1725_v44 }
 0xdd7   :  { %1680 = vmatprep.subr.bf16.mxu0 %v1891_v0 }
 0xdda   :  { %1681 = vmatpush3.bf16.msra.mxu0 %v1726_v45 }
 0xddb   :  { %1682 = vmatprep.subr.bf16.mxu0 %v1891_v0 }
 0xdde   :  { %1683 = vmatpush3.bf16.msra.mxu0 %v1727_v63 }
 0xddf   :  { %1684 = vmatprep.subr.bf16.mxu0 %v1891_v0 }
 0xde2   :  { %1685 = vmatpush3.bf16.msra.mxu0 %v1728_v1 }
 0xea8   :  { %v1055_v22 = vpop.f32.mrb[28].mxu0 }
 0xea9   :  { %v1056_v23 = vadd.f32 %v1487_v21, %v1055_v22  ;;  %v1668_v24 = vpop.f32.mrb[29].mxu0 }
 0xeaa   :  { %v1058_v25 = vpop.f32.mrb[30].mxu0 }
 0xeab   :  { %v1059_v28 = vadd.f32 %v1487_v21, %v1058_v25  ;;  %v1669_v29 = vpop.f32.mrb[31].mxu0  ;;  %v1062_v30 = vadd.f32 %v1056_v23, %v2170_v26 }
 0xead   :  { %v1068_v31 = vsel %vm123_vm1, %v1062_v30, 0.0  ;;  %v1063_v32 = vadd.f32 %v1059_v28, %v2172_v27  ;;  %v1723_v27 = vld [vmem:[%s2298_s6 + $0x10] sm:$0xff]  }
 0xeae   :  { %1069 = vadd.xlane.f32.xlu1 %v1068_v31  ;;  %1671 = vmatpush3.bf16.msra.mxu1 %v1723_v27  ;;  %v1517_v27 = vld [vmem:[%s2302_s10 + $0x1] ss:$0 sm:$0xff] }
 0xeaf   :  { %v1071_v33 = vsel %vm123_vm1, %v1063_v32, 0.0  ;;  %1672 = vmatprep.subr.bf16.mxu1 %v1891_v0 }
 0xeb0   :  { %1072 = vadd.xlane.f32.xlu0 %v1071_v33 }
 0xeb2   :  { %1673 = vmatpush3.bf16.msra.mxu1 %v1724_v43 }
 0xeb3   :  { %1690 = vmatprep.subr.bf16.mxu1 %v1891_v0 }
 0xf3b   :  { %v1070_v34 = vpop.xlane.xlu1 %1069 }
 0xf3c   :  { %v1074_v35 = vmul.f32 0.03125, %v1070_v34 }
 0xf3d   :  { %v1073_v36 = vpop.xlane.xlu0 %1072 }
 0xf3e   :  { %v1076_v37 = vsub.f32 %v1062_v30, %v1074_v35  ;;  %v1075_v38 = vmul.f32 0.03125, %v1073_v36  ;;  %v1729_v35 = vld [vmem:[%s2304_s12] sm:$0xff]   ;;  %v1730_v36 = vld [vmem:[%s2304_s12 + $0x8] sm:$0xff]  }
 0xf40   :  { %v1077_v39 = vsub.f32 %v1063_v32, %v1075_v38  ;;  %v1078_v40 = vmul.f32 %v1076_v37, %v1076_v37 }
 0xf42   :  { %v1080_v41 = vsel %vm123_vm1, %v1078_v40, 0.0  ;;  %v1079_v42 = vmul.f32 %v1077_v39, %v1077_v39 }
 0xf43   :  { %1081 = vadd.xlane.f32.xlu0 %v1080_v41 }
 0xf44   :  { %v1083_v26 = vsel %vm123_vm1, %v1079_v42, 0.0 }
 0xf45   :  { %1084 = vadd.xlane.f32.xlu1 %v1083_v26 }
 0xfd0   :  { %v1082_v46 = vpop.xlane.xlu0 %1081 }
 0xfd1   :  { %v1086_v47 = vmul.f32 0.03125, %v1082_v46 }
 0xfd2   :  { %v1085_v48 = vpop.xlane.xlu1 %1084 }
 0xfd3   :  { %v1088_v49 = vadd.f32 1e-05, %v1086_v47  ;;  %v1087_v50 = vmul.f32 0.03125, %v1085_v48 }
 0xfd5   :  { %1755 = vrsqrt.f32 %v1088_v49  ;;  %v1089_v51 = vadd.f32 1e-05, %v1087_v50 }
 0xfd7   :  { %1757 = vrsqrt.f32 %v1089_v51 }
 0xfdf   :  { %v1756_v52 = vpop.eup %1755 }
 0xfe0   :  { %v1092_v54 = vmul.f32 %v1756_v52, %v1076_v37 }
 0xfe1   :  { %v1758_v55 = vpop.eup %1757 }
 0xfe2   :  { %v1100_v56 = vmul.f32 %v1491_v53, %v1092_v54  ;;  %v1093_v57 = vmul.f32 %v1758_v55, %v1077_v39 }
 0xfe4   :  { %v1101_v59 = vmul.f32 %v1491_v53, %v1093_v57  ;;  %v1108_v60 = vadd.f32 %v1492_v58, %v1100_v56 }
 0xfe6   :  { %v1109_v61 = vadd.f32 %v1492_v58, %v1101_v59 }
 0xfe8   :  { %v1110_v62 = vpack.c.bf16 %v1109_v61, %v1108_v60 }
 0xfea   :  { %1675 = vmatmul.mubr.msk.bf16.vlgmr.msra.gmra.mrb[24].mxu1 %vm123_vm1, %v1110_v62 }
 0xfeb   :  { %1694 = vmatprep.mubr.msk.bf16.mxu1 %vm1892_vm0, %v1891_v0  ;;  %1691 = vmatpush3.bf16.msra.mxu1 %v1729_v35 }
 0xfec   :  { %1692 = vmatprep.subr.bf16.mxu1 %v1891_v0  ;;  %v1518_v0 = vld [vmem:[%s2303_s11 + $0x1] ss:$0 sm:$0xff] }
 0xfef   :  { %1693 = vmatpush3.bf16.msra.mxu1 %v1730_v36 }
0x10bd   :  { %v1173_v5 = vpop.f32.mrb[24].mxu1 }
0x10be   :  { %v1174_v6 = vadd.f32 %v1497_v2, %v1173_v5  ;;  %v1676_v7 = vpop.f32.mrb[25].mxu1 }
0x10bf   :  { %v1176_v8 = vpop.f32.mrb[26].mxu1 }
0x10c0   :  { %v1177_v9 = vadd.f32 %v1497_v2, %v1176_v8  ;;  %v1677_v10 = vpop.f32.mrb[27].mxu1  ;;  %v1180_v11 = vmax.f32 %v1174_v6, 0.0 }
0x10c2   :  { %v1181_v12 = vmax.f32 %v1177_v9, 0.0 }
0x10c4   :  { %v1182_v13 = vpack.c.bf16 %v1181_v12, %v1180_v11  ;;  %v1519_v11 = vld [vmem:[%s2305_s13] ss:$0 sm:$0xff]  ;;  %s1895_s13 = smov [#allocation10]  }
0x10c5   :  { %s1435_s29 = sshll.u32 %s1895_s13, 4  ;;  %s1436_s29 = int_to_ptr.vmem [resolvable:$true] %s1435_s29 }
0x10c6   :  { %1687 = vmatmul.mubr.msk.bf16.vlgmr.msra.gmra.mrb[32].mxu0 %vm617_vm4, %v1182_v13  ;;  %s1855_s0 = scalar_lea.vmem %s1436_s29, 32  ;;  %p1860_p5 = scmp.lt.s32.totalorder %s1436_s29, %s1436_s29 }
0x10c7   :  { %p1856_p4 = scmp.ne.s32.totalorder %s1436_s29, %s1855_s0  ;;  %p1861_p6 = scmp.lt.s32.totalorder %s1855_s0, %s1855_s0 }
0x10c9   :  { %p1862_p7 = por %p1861_p6, %p1860_p5 }
0x10cb   :  { %p1863_p8 = pnand %p1862_p7, %p1856_p4 }
0x1199   :  { %v1261_v15 = vpop.f32.mrb[32].mxu0 }
0x119a   :  { %v1262_v16 = vadd.f32 %v1509_v14, %v1261_v15  ;;  %v1688_v17 = vpop.f32.mrb[33].mxu0 }
0x119b   :  { %v1264_v18 = vpop.f32.mrb[34].mxu0 }
0x119c   :  { %v1265_v19 = vadd.f32 %v1509_v14, %v1264_v18  ;;  %v1689_v3 = vpop.f32.mrb[35].mxu0  ;;  %v1268_v4 = vadd.f32 %v1262_v16, %v1108_v60 }
0x119e   :  { %v1274_v20 = vsel %vm123_vm1, %v1268_v4, 0.0  ;;  %v1269_v21 = vadd.f32 %v1265_v19, %v1109_v61 }
0x119f   :  { %1275 = vadd.xlane.f32.xlu0 %v1274_v20 }
0x11a0   :  { %v1277_v22 = vsel %vm123_vm1, %v1269_v21, 0.0 }
0x11a1   :  { %1278 = vadd.xlane.f32.xlu1 %v1277_v22 }
0x122c   :  { %v1276_v23 = vpop.xlane.xlu0 %1275 }
0x122d   :  { %v1280_v24 = vmul.f32 0.03125, %v1276_v23 }
0x122e   :  { %v1279_v25 = vpop.xlane.xlu1 %1278 }
0x122f   :  { %v1282_v28 = vsub.f32 %v1268_v4, %v1280_v24  ;;  %v1281_v29 = vmul.f32 0.03125, %v1279_v25 }
0x1231   :  { %v1283_v30 = vsub.f32 %v1269_v21, %v1281_v29  ;;  %v1284_v31 = vmul.f32 %v1282_v28, %v1282_v28 }
0x1233   :  { %v1286_v32 = vsel %vm123_vm1, %v1284_v31, 0.0  ;;  %v1285_v33 = vmul.f32 %v1283_v30, %v1283_v30 }
0x1234   :  { %1287 = vadd.xlane.f32.xlu0 %v1286_v32 }
0x1235   :  { %v1289_v34 = vsel %vm123_vm1, %v1285_v33, 0.0 }
0x1236   :  { %1290 = vadd.xlane.f32.xlu1 %v1289_v34 }
0x12c1   :  { %v1288_v37 = vpop.xlane.xlu0 %1287 }
0x12c2   :  { %v1292_v38 = vmul.f32 0.03125, %v1288_v37 }
0x12c3   :  { %v1291_v39 = vpop.xlane.xlu1 %1290 }
0x12c4   :  { %v1294_v40 = vadd.f32 1e-05, %v1292_v38  ;;  %v1293_v41 = vmul.f32 0.03125, %v1291_v39 }
0x12c6   :  { %1759 = vrsqrt.f32 %v1294_v40  ;;  %v1295_v42 = vadd.f32 1e-05, %v1293_v41 }
0x12c8   :  { %1761 = vrsqrt.f32 %v1295_v42 }
0x12d0   :  { %v1760_v26 = vpop.eup %1759 }
0x12d1   :  { %v1298_v43 = vmul.f32 %v1760_v26, %v1282_v28 }
0x12d2   :  { %v1762_v44 = vpop.eup %1761 }
0x12d3   :  { %v1306_v45 = vmul.f32 %v1517_v27, %v1298_v43  ;;  %v1299_v46 = vmul.f32 %v1762_v44, %v1283_v30 }
0x12d5   :  { %v1314_v47 = vadd.f32 %v1518_v0, %v1306_v45  ;;  %v1307_v48 = vmul.f32 %v1517_v27, %v1299_v46 }
0x12d7   :  { %v1316_v49 = vsel %vm123_vm1, %v1314_v47, 0.0  ;;  %v1315_v50 = vadd.f32 %v1518_v0, %v1307_v48 }
0x12d8   :  { %v1317_v51 = vrot.slane %v1316_v49, 4 }
0x12d9   :  { %v1323_v52 = vsel %vm123_vm1, %v1315_v50, 0.0 }
0x12da   :  { %v1318_v53 = vadd.f32 %v1317_v51, %v1316_v49  ;;  %v1324_v54 = vrot.slane %v1323_v52, 4 }
0x12dc   :  { %v1319_v55 = vrot.slane %v1318_v53, 2  ;;  %v1325_v56 = vadd.f32 %v1324_v54, %v1323_v52 }
0x12de   :  { %v1326_v57 = vrot.slane %v1325_v56, 2  ;;  %v1320_v58 = vadd.f32 %v1319_v55, %v1318_v53 }
0x12e0   :  { %v1321_v59 = vrot.slane %v1320_v58, 1  ;;  %v1327_v60 = vadd.f32 %v1326_v57, %v1325_v56 }
0x12e2   :  { %v1322_v61 = vadd.f32 %v1321_v59, %v1320_v58  ;;  %v1328_v62 = vrot.slane %v1327_v60, 1 }
0x12e4   :  { %v1329_v63 = vadd.f32 %v1328_v62, %v1327_v60  ;;  %v1331_v1 = vmul.f32 0.125, %v1322_v61 }
0x12e6   :  { %v1332_v2 = vmul.f32 0.125, %v1329_v63  ;;  %v1333_v5 = vpack.c.bf16 %v1331_v1, %v1331_v1 }
0x12e8   :  { %v1334_v6 = vpack.c.bf16 %v1332_v2, %v1332_v2  ;;  %v1348_v7 = vunpack.c.l.b16 %v1333_v5 }
0x12ea   :  { %v1349_v8 = vunpack.c.l.b16 %v1334_v6 }
0x12ec   :  { %v1351_v9 = vsel %vm1350_vm5, %v1349_v8, %v1348_v7 }
0x12ed   :  { %v1352_v10 = vpack.c.b16 %v1351_v9, %v1351_v9 }
0x12ef   :  { %1695 = vmatmul.mubr.msk.bf16.vlgmr.msra.gmra.mrb[28].mxu1 %vm123_vm1, %v1352_v10 }
0x13c2   :  { %v1402_v12 = vpop.f32.mrb[28].mxu1 }
0x13c3   :  { %v1403_v13 = vadd.f32 %v1519_v11, %v1402_v12  ;;  %v1696_v14 = vpop.f32.mrb[29].mxu1 }
0x13c4   :  { %v1405_v15 = vpop.f32.mrb[30].mxu1 }
0x13c5   :  { %v1409_v16 = vsel %vm1408_vm6, %v1403_v13, -inf  ;;  %v1697_v17 = vpop.f32.mrb[31].mxu1 }
0x13c6   :  { %v1410_v18 = vrot.slane %v1409_v16, 4 }
0x13c8   :  { %v1411_v19 = vmax.f32 %v1409_v16, %v1410_v18 }
0x13ca   :  { %v1412_v3 = vrot.slane %v1411_v19, 2 }
0x13cc   :  { %v1413_v4 = vmax.f32 %v1411_v19, %v1412_v3 }
0x13ce   :  { %v1414_v20 = vrot.slane %v1413_v4, 1 }
0x13d0   :  { %v1415_v21 = vmax.f32 %v1413_v4, %v1414_v20 }
0x13d2   :  { %v1416_v22 = vsub.f32 %v1403_v13, %v1415_v21 }
0x13d4   :  { %v1417_v23 = vmul.f32 1.442695, %v1416_v22 }
0x13d6   :  { %1763 = vpow2.f32 %v1417_v23 }
0x13e0   :  { %v1764_v24 = vpop.eup %1763 }
0x13e1   :  { %v1419_v25 = vsel %vm1408_vm6, %v1764_v24, 0.0 }
0x13e2   :  { %v1420_v28 = vrot.slane %v1419_v25, 4 }
0x13e4   :  { %v1421_v29 = vadd.f32 %v1420_v28, %v1419_v25 }
0x13e6   :  { %v1422_v30 = vrot.slane %v1421_v29, 2 }
0x13e8   :  { %v1423_v31 = vadd.f32 %v1422_v30, %v1421_v29 }
0x13ea   :  { %v1424_v32 = vrot.slane %v1423_v31, 1 }
0x13ec   :  { %v1425_v33 = vadd.f32 %v1424_v32, %v1423_v31 }
0x13ee   :  { %1765 = vrcp.f32 %v1425_v33 }
0x13f8   :  { %v1766_v34 = vpop.eup %1765 }
0x13f9   :  { %v1427_v35 = vmul.f32 %v1766_v34, %v1764_v24 }
0x13fb   :  { %1428 = vst.msk [vmem:[#allocation10] sm:$0x3] %vm1408_vm6, %v1427_v35 }
0x13fc   :  { %1866 = shalt.err (!%p1863_p8)
}
0x13fd   :  { %s1867_s17 = scalar_lea.hbm %s2306_s14, 32 }
0x13fe   :  { %p1868_p9 = scmp.ne.s32.totalorder %s2306_s14, %s1867_s17  ;;  %p1871_p10 = scmp.lt.u32.totalorder %s1867_s17, %s2306_s14 }
0x1400   :  { %p1873_p11 = pnand %p1871_p10, %p1868_p9 }
0x1402   :  { %1876 = shalt.err (!%p1873_p11)
}
0x1403   :  { %1438 = dma.vmem_to_hbm [thread:$0]  %s1436_s29, 32, %s2306_s14, [#allocation4]  }
0x1404   :  { %1883 = dma.done.wait [#allocation4], 32  }
0x1405   :  { %1884 = vsyncadd [#allocation4], 4294967264 }
0x1406   :  { %1442 = vsyncpa [#allocation3], 1 }
0x1407   :  { %1443 = vsyncpa [#allocation6], 1 }
0x1408   :  { %1444 = vsyncpa [#allocation9], 1 }
0x1409   :  { %1445 = vsyncpa [#allocation4], 1 }

</bundles_post_ra>
